<compile_context>
chip_gen: v7x
topology: tpu7x:2x2x1
jax: 0.10.0
libtpu: 0.0.40
codegen_flags: <defaults>
</compile_context>

<pallas_src>
import jax
import jax.numpy as jnp
from jax import lax
from jax.experimental import pallas as pl
from jax.experimental.pallas import tpu as pltpu


# ----------------------------------------------------------------------------
# Fused GRU-stack + fc(relu(.)) kernel.  No grid: weights, activations and the
# time-staged projections all live in VMEM; the recurrence is a fori_loop.
#
# Inputs:
#   x        : (B, T, D)   raw batch-first input
#   h0       : (L, B, H)   initial hidden state (aliased to hout)
#   wih0     : (D, 3H)     fused layer-0 input weight, gate order r,z,n
#   bi0      : (1, 3H)     fused layer-0 input bias  [b_ir+b_hr, b_iz+b_hz, b_in]
#   whh_all  : (L, H, 3H)  fused recurrent weights (priming + last layer)
#   wcomb    : (Lm1, H, 6H) [W_hh(l) | W_ih(l+1)] for l = 0..L-2
#   bi_rest  : (Lm1, 1, 3H) fused input bias of layer l+1
#   bhn_all  : (L, 1, H)   b_hn (kept separate for the n gate)
#   fc_w     : (H, O), fc_b : (1, O)
# Outputs:
#   out      : (B, O)      fc(relu(h_top[T-1]))
#   hout     : (L, B, H)   final hidden state per layer
# Scratch:
#   xp_ref   : VMEM (2, T, B, 3H) ping-pong buffer of input projections
# ----------------------------------------------------------------------------
def grunet_kernel(x_ref, h0_ref, wih0_ref, bi0_ref, whh_ref, wcomb_ref,
                  bi_rest_ref, bhn_ref, fcw_ref, fcb_ref,
                  out_ref, hout_ref, xp_ref):
    B, T, D = x_ref.shape
    L, _, H = h0_ref.shape
    G = 3 * H

    # ---- layer-0 input projection: one (B*T, D) @ (D, 3H) matmul, hoisted
    # ---- off the recurrence, scattered into the time-major scratch slot 0.
    x_all = x_ref[...]                                         # (B, T, D)
    xp0 = jnp.dot(x_all.reshape(B * T, D), wih0_ref[...],
                  preferred_element_type=jnp.float32) + bi0_ref[...]
    xp0 = xp0.reshape(B, T, G)
    for t in range(T):                                         # static scatter
        xp_ref[0, t] = xp0[:, t, :]

    # ---- GRU layer stack (L is small & static -> Python loop over layers) ----
    h = h0_ref[0]
    for l in range(L):
        last = (l == L - 1)
        slot = l % 2
        nslot = 1 - slot
        whh = whh_ref[l]                                       # (H, 3H)
        bhn_b = jnp.broadcast_to(bhn_ref[l], (B, H))           # hoisted broadcast
        h = h0_ref[l]                                          # (B, H)

        if last:
            def step(t, h):
                gi = xp_ref[slot, t]                           # (B, 3H)
                gh = jnp.dot(h, whh, preferred_element_type=jnp.float32)
                a = gi + gh                                    # one full-width add
                rz = jax.nn.sigmoid(a[:, : 2 * H])
                r, z = rz[:, :H], rz[:, H:]
                n = jnp.tanh(gi[:, 2 * H:] + r * (gh[:, 2 * H:] + bhn_b))
                return (1.0 - z) * n + z * h

            h = lax.fori_loop(0, T, step, h, unroll=True)
        else:
            w_step = wcomb_ref[l]                              # (H, 6H)
            bi_nxt_b = jnp.broadcast_to(bi_rest_ref[l], (B, G))
            # prime gh(0) = h0 @ W_hh(l); afterwards gh comes from the fused push
            gh0 = jnp.dot(h, whh, preferred_element_type=jnp.float32)

            def step(t, carry):
                h, gh = carry
                gi = xp_ref[slot, t]                           # (B, 3H)
                a = gi + gh
                rz = jax.nn.sigmoid(a[:, : 2 * H])
                r, z = rz[:, :H], rz[:, H:]
                n = jnp.tanh(gi[:, 2 * H:] + r * (gh[:, 2 * H:] + bhn_b))
                h_new = (1.0 - z) * n + z * h
                # single fused MXU push on h_new: [gh(t+1) | next-layer proj(t)]
                comb = jnp.dot(h_new, w_step, preferred_element_type=jnp.float32)
                xp_ref[nslot, t] = comb[:, G:] + bi_nxt_b      # hoisted for layer l+1
                return (h_new, comb[:, :G])

            h, _ = lax.fori_loop(0, T, step, (h, gh0), unroll=True)

        hout_ref[l] = h.astype(hout_ref.dtype)                 # once per layer

    # ---- fused head: out = fc(relu(h_top)) ----
    top = jnp.maximum(h, 0.0)
    out_ref[...] = (jnp.dot(top, fcw_ref[...], preferred_element_type=jnp.float32)
                    + fcb_ref[...]).astype(out_ref.dtype)


# ----------------------------------------------------------------------------
# Wrapper: a single fused Pallas call, no wrapper-side projections/transposes.
# ----------------------------------------------------------------------------
@jax.jit
def grunet_forward(x, h, kp):
    # x: (B, T, D) batch_first ; h: (L, B, H)
    B, T, _ = x.shape
    L, _, H = h.shape
    O = kp["fc_w"].shape[-1]

    out, h_out = pl.pallas_call(
        grunet_kernel,
        out_shape=(
            jax.ShapeDtypeStruct((B, O), jnp.float32),
            jax.ShapeDtypeStruct((L, B, H), jnp.float32),
        ),
        scratch_shapes=[pltpu.VMEM((2, T, B, 3 * H), jnp.float32)],
        input_output_aliases={1: 1},    # h0 (input 1) -> hout (output 1)
        compiler_params=pltpu.CompilerParams(
            vmem_limit_bytes=32 * 1024 * 1024),
    )(x, h, kp["wih0"], kp["bi0"], kp["whh_all"], kp["wcomb"],
      kp["bi_rest"], kp["bhn_all"], kp["fc_w"], kp["fc_b"])
    return out, h_out


# ----------------------------------------------------------------------------
# Parameter construction (PyTorch-like uniform(-k, k)), raw per-gate layout.
# ----------------------------------------------------------------------------
def init_params(key, input_dim, hidden_dim, output_dim, n_layers):
    k = 1.0 / jnp.sqrt(hidden_dim)
    params = {"gru": []}
    for layer in range(n_layers):
        d_in = input_dim if layer == 0 else hidden_dim
        key, k1, k2, k3, k4 = jax.random.split(key, 5)
        w_ih = jax.random.uniform(k1, (3, d_in, hidden_dim), jnp.float32, -k, k)
        w_hh = jax.random.uniform(k2, (3, hidden_dim, hidden_dim), jnp.float32, -k, k)
        b_ih = jax.random.uniform(k3, (3, 1, hidden_dim), jnp.float32, -k, k)
        b_hh = jax.random.uniform(k4, (3, 1, hidden_dim), jnp.float32, -k, k)
        params["gru"].append((w_ih, w_hh, b_ih, b_hh))
    key, k5, k6 = jax.random.split(key, 3)
    params["fc_w"] = jax.random.uniform(k5, (hidden_dim, output_dim), jnp.float32, -k, k)
    params["fc_b"] = jax.random.uniform(k6, (1, output_dim), jnp.float32, -k, k)
    return params


def pack_params(params, n_layers):
    """Fuse gates into (D, 3H) weights, pre-sum r/z biases, build the per-step
    fused (H, 6H) = [W_hh(l) | W_ih(l+1)] weights, and stack layers."""
    def fuse_w(w):                       # (3, D, H) -> (D, 3H), gate order r,z,n
        return jnp.concatenate([w[0], w[1], w[2]], axis=-1)

    def fuse_bi(b_ih, b_hh):             # (1, 3H): [b_ir+b_hr, b_iz+b_hz, b_in]
        return jnp.concatenate([b_ih[0] + b_hh[0], b_ih[1] + b_hh[1], b_ih[2]],
                               axis=-1)

    gru = params["gru"]
    H = gru[0][1].shape[-1]
    w_ih_f = [fuse_w(g[0]) for g in gru]               # (D_in or H, 3H)
    w_hh_f = [fuse_w(g[1]) for g in gru]               # (H, 3H)
    bi_f = [fuse_bi(g[2], g[3]) for g in gru]          # (1, 3H)
    bhn = [g[3][2] for g in gru]                       # (1, H)

    kp = {
        "wih0": w_ih_f[0],                             # (D_in, 3H)
        "bi0": bi_f[0],                                # (1, 3H)
        "whh_all": jnp.stack(w_hh_f),                  # (L, H, 3H)
        "bhn_all": jnp.stack(bhn),                     # (L, 1, H)
        "fc_w": params["fc_w"],                        # (H, O)
        "fc_b": params["fc_b"],                        # (1, O)
    }
    if n_layers > 1:
        kp["wcomb"] = jnp.stack(
            [jnp.concatenate([w_hh_f[l], w_ih_f[l + 1]], axis=-1)
             for l in range(n_layers - 1)])            # (L-1, H, 6H)
        kp["bi_rest"] = jnp.stack(bi_f[1:])            # (L-1, 1, 3H)
    else:  # dummies (statically unused in the kernel)
        kp["wcomb"] = jnp.zeros((1, H, 6 * H), jnp.float32)
        kp["bi_rest"] = jnp.zeros((1, 1, 3 * H), jnp.float32)
    return kp


# ----------------------------------------------------------------------------
# Pure-JAX reference (raw per-gate params) for the correctness check.
# ----------------------------------------------------------------------------
def grunet_ref(x, h, params, n_layers):
    layer_in = jnp.transpose(x, (1, 0, 2))  # (T, B, D)
    h_finals = []
    for l in range(n_layers):
        w_ih, w_hh, b_ih, b_hh = params["gru"][l]
        h_t = h[l]
        outs = []
        for t in range(layer_in.shape[0]):
            x_t = layer_in[t]
            i_r = x_t @ w_ih[0] + b_ih[0]
            i_z = x_t @ w_ih[1] + b_ih[1]
            i_n = x_t @ w_ih[2] + b_ih[2]
            h_r = h_t @ w_hh[0] + b_hh[0]
            h_z = h_t @ w_hh[1] + b_hh[1]
            h_n = h_t @ w_hh[2] + b_hh[2]
            r = jax.nn.sigmoid(i_r + h_r)
            z = jax.nn.sigmoid(i_z + h_z)
            n = jnp.tanh(i_n + r * h_n)
            h_t = (1.0 - z) * n + z * h_t
            outs.append(h_t)
        layer_in = jnp.stack(outs, axis=0)
        h_finals.append(h_t)
    last = layer_in[-1]
    out = jnp.maximum(last, 0.0) @ params["fc_w"] + params["fc_b"]
    return out, jnp.stack(h_finals, axis=0)


if __name__ == "__main__":
    B, T = 2, 8
    input_dim, hidden_dim, output_dim, n_layers = 4, 32, 4, 2

    key = jax.random.PRNGKey(0)
    kx, kh, kp_key = jax.random.split(key, 3)
    x = jax.random.normal(kx, (B, T, input_dim), jnp.float32)
    h0 = jax.random.normal(kh, (n_layers, B, hidden_dim), jnp.float32)
    params = init_params(kp_key, input_dim, hidden_dim, output_dim, n_layers)
    kernel_params = pack_params(params, n_layers)

    out, h_n = grunet_forward(x, h0, kernel_params)
    out = jax.block_until_ready(out)
    h_n = jax.block_until_ready(h_n)

    out_ref, h_ref = grunet_ref(x, h0, params, n_layers)
    assert out.shape == (B, output_dim) and h_n.shape == (n_layers, B, hidden_dim)
    assert jnp.allclose(out, out_ref, atol=1e-4, rtol=1e-4)
    assert jnp.allclose(h_n, h_ref, atol=1e-4, rtol=1e-4)

    print("KERNEL_OK")
</pallas_src>

<mosaic_0001>
module attributes {stable_mosaic.version = 11 : i64} {
  func.func @grunet_kernel(%arg0: memref<2x8x4xf32, #tpu.memory_space<vmem>>, %arg1: memref<2x2x32xf32, #tpu.memory_space<vmem>>, %arg2: memref<4x96xf32, #tpu.memory_space<vmem>>, %arg3: memref<1x96xf32, #tpu.memory_space<vmem>>, %arg4: memref<2x32x96xf32, #tpu.memory_space<vmem>>, %arg5: memref<1x32x192xf32, #tpu.memory_space<vmem>>, %arg6: memref<1x1x96xf32, #tpu.memory_space<vmem>>, %arg7: memref<2x1x32xf32, #tpu.memory_space<vmem>>, %arg8: memref<32x4xf32, #tpu.memory_space<vmem>>, %arg9: memref<1x4xf32, #tpu.memory_space<vmem>>, %arg10: memref<2x4xf32, #tpu.memory_space<vmem>>, %arg11: memref<2x2x32xf32, #tpu.memory_space<vmem>>, %arg12: memref<2x8x2x96xf32, #tpu.memory_space<vmem>>) attributes {dimension_semantics = [], scalar_prefetch = 0 : i64, scratch_operands = 1 : i64, tpu.core_type = #tpu.core_type<tc>} {
    %c0 = arith.constant 0 : index
    %c0_0 = arith.constant 0 : index
    %c0_1 = arith.constant 0 : index
    %0 = vector.load %arg0[%c0, %c0_0, %c0_1] : memref<2x8x4xf32, #tpu.memory_space<vmem>>, vector<2x8x4xf32>
    %1 = vector.shape_cast %0 : vector<2x8x4xf32> to vector<16x4xf32>
    %c0_2 = arith.constant 0 : index
    %c0_3 = arith.constant 0 : index
    %2 = vector.load %arg2[%c0_2, %c0_3] : memref<4x96xf32, #tpu.memory_space<vmem>>, vector<4x96xf32>
    %cst = arith.constant dense<0.000000e+00> : vector<16x96xf32>
    %3 = tpu.matmul %1, %2, %cst {dimension_numbers = #tpu.dot_dimension_numbers<[1], [0], [0], [1], [0, 0, 1, 1], [], []>} : vector<16x4xf32>, vector<4x96xf32>, vector<16x96xf32> -> vector<16x96xf32>
    %c0_4 = arith.constant 0 : index
    %c0_5 = arith.constant 0 : index
    %4 = vector.load %arg3[%c0_4, %c0_5] : memref<1x96xf32, #tpu.memory_space<vmem>>, vector<1x96xf32>
    %5 = vector.broadcast %4 : vector<1x96xf32> to vector<16x96xf32>
    %6 = arith.addf %3, %5 : vector<16x96xf32>
    %7 = vector.shape_cast %6 : vector<16x96xf32> to vector<2x8x96xf32>
    %8 = vector.extract_strided_slice %7 {offsets = [0, 0, 0], sizes = [2, 1, 96], strides = [1, 1, 1]} : vector<2x8x96xf32> to vector<2x1x96xf32>
    %9 = vector.shape_cast %8 : vector<2x1x96xf32> to vector<2x96xf32>
    %c0_6 = arith.constant 0 : index
    %c0_7 = arith.constant 0 : index
    %c0_8 = arith.constant 0 : index
    %c0_9 = arith.constant 0 : index
    %10 = vector.load %arg12[%c0_6, %c0_7, %c0_8, %c0_9] : memref<2x8x2x96xf32, #tpu.memory_space<vmem>>, vector<1x1x2x96xf32>
    %11 = vector.shape_cast %10 : vector<1x1x2x96xf32> to vector<2x96xf32>
    %12 = vector.shape_cast %9 : vector<2x96xf32> to vector<1x1x2x96xf32>
    tpu.vector_store %arg12[%c0_6, %c0_7, %c0_8, %c0_9], %12 {strides = array<i32>} : memref<2x8x2x96xf32, #tpu.memory_space<vmem>>, vector<1x1x2x96xf32>,
    %13 = vector.extract_strided_slice %7 {offsets = [0, 1, 0], sizes = [2, 1, 96], strides = [1, 1, 1]} : vector<2x8x96xf32> to vector<2x1x96xf32>
    %14 = vector.shape_cast %13 : vector<2x1x96xf32> to vector<2x96xf32>
    %c0_10 = arith.constant 0 : index
    %c1 = arith.constant 1 : index
    %c0_11 = arith.constant 0 : index
    %c0_12 = arith.constant 0 : index
    %15 = vector.load %arg12[%c0_10, %c1, %c0_11, %c0_12] : memref<2x8x2x96xf32, #tpu.memory_space<vmem>>, vector<1x1x2x96xf32>
    %16 = vector.shape_cast %15 : vector<1x1x2x96xf32> to vector<2x96xf32>
    %17 = vector.shape_cast %14 : vector<2x96xf32> to vector<1x1x2x96xf32>
    tpu.vector_store %arg12[%c0_10, %c1, %c0_11, %c0_12], %17 {strides = array<i32>} : memref<2x8x2x96xf32, #tpu.memory_space<vmem>>, vector<1x1x2x96xf32>,
    %18 = vector.extract_strided_slice %7 {offsets = [0, 2, 0], sizes = [2, 1, 96], strides = [1, 1, 1]} : vector<2x8x96xf32> to vector<2x1x96xf32>
    %19 = vector.shape_cast %18 : vector<2x1x96xf32> to vector<2x96xf32>
    %c0_13 = arith.constant 0 : index
    %c2 = arith.constant 2 : index
    %c0_14 = arith.constant 0 : index
    %c0_15 = arith.constant 0 : index
    %20 = vector.load %arg12[%c0_13, %c2, %c0_14, %c0_15] : memref<2x8x2x96xf32, #tpu.memory_space<vmem>>, vector<1x1x2x96xf32>
    %21 = vector.shape_cast %20 : vector<1x1x2x96xf32> to vector<2x96xf32>
    %22 = vector.shape_cast %19 : vector<2x96xf32> to vector<1x1x2x96xf32>
    tpu.vector_store %arg12[%c0_13, %c2, %c0_14, %c0_15], %22 {strides = array<i32>} : memref<2x8x2x96xf32, #tpu.memory_space<vmem>>, vector<1x1x2x96xf32>,
    %23 = vector.extract_strided_slice %7 {offsets = [0, 3, 0], sizes = [2, 1, 96], strides = [1, 1, 1]} : vector<2x8x96xf32> to vector<2x1x96xf32>
    %24 = vector.shape_cast %23 : vector<2x1x96xf32> to vector<2x96xf32>
    %c0_16 = arith.constant 0 : index
    %c3 = arith.constant 3 : index
    %c0_17 = arith.constant 0 : index
    %c0_18 = arith.constant 0 : index
    %25 = vector.load %arg12[%c0_16, %c3, %c0_17, %c0_18] : memref<2x8x2x96xf32, #tpu.memory_space<vmem>>, vector<1x1x2x96xf32>
    %26 = vector.shape_cast %25 : vector<1x1x2x96xf32> to vector<2x96xf32>
    %27 = vector.shape_cast %24 : vector<2x96xf32> to vector<1x1x2x96xf32>
    tpu.vector_store %arg12[%c0_16, %c3, %c0_17, %c0_18], %27 {strides = array<i32>} : memref<2x8x2x96xf32, #tpu.memory_space<vmem>>, vector<1x1x2x96xf32>,
    %28 = vector.extract_strided_slice %7 {offsets = [0, 4, 0], sizes = [2, 1, 96], strides = [1, 1, 1]} : vector<2x8x96xf32> to vector<2x1x96xf32>
    %29 = vector.shape_cast %28 : vector<2x1x96xf32> to vector<2x96xf32>
    %c0_19 = arith.constant 0 : index
    %c4 = arith.constant 4 : index
    %c0_20 = arith.constant 0 : index
    %c0_21 = arith.constant 0 : index
    %30 = vector.load %arg12[%c0_19, %c4, %c0_20, %c0_21] : memref<2x8x2x96xf32, #tpu.memory_space<vmem>>, vector<1x1x2x96xf32>
    %31 = vector.shape_cast %30 : vector<1x1x2x96xf32> to vector<2x96xf32>
    %32 = vector.shape_cast %29 : vector<2x96xf32> to vector<1x1x2x96xf32>
    tpu.vector_store %arg12[%c0_19, %c4, %c0_20, %c0_21], %32 {strides = array<i32>} : memref<2x8x2x96xf32, #tpu.memory_space<vmem>>, vector<1x1x2x96xf32>,
    %33 = vector.extract_strided_slice %7 {offsets = [0, 5, 0], sizes = [2, 1, 96], strides = [1, 1, 1]} : vector<2x8x96xf32> to vector<2x1x96xf32>
    %34 = vector.shape_cast %33 : vector<2x1x96xf32> to vector<2x96xf32>
    %c0_22 = arith.constant 0 : index
    %c5 = arith.constant 5 : index
    %c0_23 = arith.constant 0 : index
    %c0_24 = arith.constant 0 : index
    %35 = vector.load %arg12[%c0_22, %c5, %c0_23, %c0_24] : memref<2x8x2x96xf32, #tpu.memory_space<vmem>>, vector<1x1x2x96xf32>
    %36 = vector.shape_cast %35 : vector<1x1x2x96xf32> to vector<2x96xf32>
    %37 = vector.shape_cast %34 : vector<2x96xf32> to vector<1x1x2x96xf32>
    tpu.vector_store %arg12[%c0_22, %c5, %c0_23, %c0_24], %37 {strides = array<i32>} : memref<2x8x2x96xf32, #tpu.memory_space<vmem>>, vector<1x1x2x96xf32>,
    %38 = vector.extract_strided_slice %7 {offsets = [0, 6, 0], sizes = [2, 1, 96], strides = [1, 1, 1]} : vector<2x8x96xf32> to vector<2x1x96xf32>
    %39 = vector.shape_cast %38 : vector<2x1x96xf32> to vector<2x96xf32>
    %c0_25 = arith.constant 0 : index
    %c6 = arith.constant 6 : index
    %c0_26 = arith.constant 0 : index
    %c0_27 = arith.constant 0 : index
    %40 = vector.load %arg12[%c0_25, %c6, %c0_26, %c0_27] : memref<2x8x2x96xf32, #tpu.memory_space<vmem>>, vector<1x1x2x96xf32>
    %41 = vector.shape_cast %40 : vector<1x1x2x96xf32> to vector<2x96xf32>
    %42 = vector.shape_cast %39 : vector<2x96xf32> to vector<1x1x2x96xf32>
    tpu.vector_store %arg12[%c0_25, %c6, %c0_26, %c0_27], %42 {strides = array<i32>} : memref<2x8x2x96xf32, #tpu.memory_space<vmem>>, vector<1x1x2x96xf32>,
    %43 = vector.extract_strided_slice %7 {offsets = [0, 7, 0], sizes = [2, 1, 96], strides = [1, 1, 1]} : vector<2x8x96xf32> to vector<2x1x96xf32>
    %44 = vector.shape_cast %43 : vector<2x1x96xf32> to vector<2x96xf32>
    %c0_28 = arith.constant 0 : index
    %c7 = arith.constant 7 : index
    %c0_29 = arith.constant 0 : index
    %c0_30 = arith.constant 0 : index
    %45 = vector.load %arg12[%c0_28, %c7, %c0_29, %c0_30] : memref<2x8x2x96xf32, #tpu.memory_space<vmem>>, vector<1x1x2x96xf32>
    %46 = vector.shape_cast %45 : vector<1x1x2x96xf32> to vector<2x96xf32>
    %47 = vector.shape_cast %44 : vector<2x96xf32> to vector<1x1x2x96xf32>
    tpu.vector_store %arg12[%c0_28, %c7, %c0_29, %c0_30], %47 {strides = array<i32>} : memref<2x8x2x96xf32, #tpu.memory_space<vmem>>, vector<1x1x2x96xf32>,
    %c0_31 = arith.constant 0 : index
    %c0_32 = arith.constant 0 : index
    %c0_33 = arith.constant 0 : index
    %48 = vector.load %arg4[%c0_31, %c0_32, %c0_33] : memref<2x32x96xf32, #tpu.memory_space<vmem>>, vector<1x32x96xf32>
    %49 = vector.shape_cast %48 : vector<1x32x96xf32> to vector<32x96xf32>
    %c0_34 = arith.constant 0 : index
    %c0_35 = arith.constant 0 : index
    %c0_36 = arith.constant 0 : index
    %50 = vector.load %arg7[%c0_34, %c0_35, %c0_36] : memref<2x1x32xf32, #tpu.memory_space<vmem>>, vector<1x1x32xf32>
    %51 = vector.shape_cast %50 : vector<1x1x32xf32> to vector<1x32xf32>
    %52 = vector.shape_cast %51 : vector<1x32xf32> to vector<1x32xf32>
    %53 = vector.broadcast %52 : vector<1x32xf32> to vector<2x32xf32>
    %c0_37 = arith.constant 0 : index
    %c0_38 = arith.constant 0 : index
    %c0_39 = arith.constant 0 : index
    %54 = vector.load %arg1[%c0_37, %c0_38, %c0_39] : memref<2x2x32xf32, #tpu.memory_space<vmem>>, vector<1x2x32xf32>
    %55 = vector.shape_cast %54 : vector<1x2x32xf32> to vector<2x32xf32>
    %c0_40 = arith.constant 0 : index
    %c0_41 = arith.constant 0 : index
    %c0_42 = arith.constant 0 : index
    %56 = vector.load %arg5[%c0_40, %c0_41, %c0_42] : memref<1x32x192xf32, #tpu.memory_space<vmem>>, vector<1x32x192xf32>
    %57 = vector.shape_cast %56 : vector<1x32x192xf32> to vector<32x192xf32>
    %c0_43 = arith.constant 0 : index
    %c0_44 = arith.constant 0 : index
    %c0_45 = arith.constant 0 : index
    %58 = vector.load %arg6[%c0_43, %c0_44, %c0_45] : memref<1x1x96xf32, #tpu.memory_space<vmem>>, vector<1x1x96xf32>
    %59 = vector.shape_cast %58 : vector<1x1x96xf32> to vector<1x96xf32>
    %60 = vector.shape_cast %59 : vector<1x96xf32> to vector<1x96xf32>
    %61 = vector.broadcast %60 : vector<1x96xf32> to vector<2x96xf32>
    %cst_46 = arith.constant dense<0.000000e+00> : vector<2x96xf32>
    %62 = tpu.matmul %55, %49, %cst_46 {dimension_numbers = #tpu.dot_dimension_numbers<[1], [0], [0], [1], [0, 0, 1, 1], [], []>} : vector<2x32xf32>, vector<32x96xf32>, vector<2x96xf32> -> vector<2x96xf32>
    %c0_i32 = arith.constant 0 : i32
    %c0_47 = arith.constant 0 : index
    %63 = arith.index_cast %c0_i32 : i32 to index
    %c0_48 = arith.constant 0 : index
    %c0_49 = arith.constant 0 : index
    %64 = vector.load %arg12[%c0_47, %63, %c0_48, %c0_49] : memref<2x8x2x96xf32, #tpu.memory_space<vmem>>, vector<1x1x2x96xf32>
    %65 = vector.shape_cast %64 : vector<1x1x2x96xf32> to vector<2x96xf32>
    %66 = arith.addf %65, %62 : vector<2x96xf32>
    %67 = vector.extract_strided_slice %66 {offsets = [0, 0], sizes = [2, 64], strides = [1, 1]} : vector<2x96xf32> to vector<2x64xf32>
    %68 = arith.negf %67 : vector<2x64xf32>
    %69 = math.exp %68 : vector<2x64xf32>
    %cst_50 = arith.constant 1.000000e+00 : f32
    %70 = vector.broadcast %cst_50 : f32 to vector<2x64xf32>
    %71 = arith.addf %70, %69 : vector<2x64xf32>
    %72 = arith.divf %70, %71 : vector<2x64xf32>
    %73 = vector.extract_strided_slice %72 {offsets = [0, 0], sizes = [2, 32], strides = [1, 1]} : vector<2x64xf32> to vector<2x32xf32>
    %74 = vector.extract_strided_slice %72 {offsets = [0, 32], sizes = [2, 32], strides = [1, 1]} : vector<2x64xf32> to vector<2x32xf32>
    %75 = vector.extract_strided_slice %65 {offsets = [0, 64], sizes = [2, 32], strides = [1, 1]} : vector<2x96xf32> to vector<2x32xf32>
    %76 = vector.extract_strided_slice %62 {offsets = [0, 64], sizes = [2, 32], strides = [1, 1]} : vector<2x96xf32> to vector<2x32xf32>
    %77 = arith.addf %76, %53 : vector<2x32xf32>
    %78 = arith.mulf %73, %77 : vector<2x32xf32>
    %79 = arith.addf %75, %78 : vector<2x32xf32>
    %80 = math.tanh %79 : vector<2x32xf32>
    %cst_51 = arith.constant 1.000000e+00 : f32
    %81 = vector.broadcast %cst_51 : f32 to vector<2x32xf32>
    %82 = arith.subf %81, %74 : vector<2x32xf32>
    %83 = arith.mulf %82, %80 : vector<2x32xf32>
    %84 = arith.mulf %74, %55 : vector<2x32xf32>
    %85 = arith.addf %83, %84 : vector<2x32xf32>
    %cst_52 = arith.constant dense<0.000000e+00> : vector<2x192xf32>
    %86 = tpu.matmul %85, %57, %cst_52 {dimension_numbers = #tpu.dot_dimension_numbers<[1], [0], [0], [1], [0, 0, 1, 1], [], []>} : vector<2x32xf32>, vector<32x192xf32>, vector<2x192xf32> -> vector<2x192xf32>
    %87 = vector.extract_strided_slice %86 {offsets = [0, 96], sizes = [2, 96], strides = [1, 1]} : vector<2x192xf32> to vector<2x96xf32>
    %88 = arith.addf %87, %61 : vector<2x96xf32>
    %c1_53 = arith.constant 1 : index
    %89 = arith.index_cast %c0_i32 : i32 to index
    %c0_54 = arith.constant 0 : index
    %c0_55 = arith.constant 0 : index
    %90 = vector.load %arg12[%c1_53, %89, %c0_54, %c0_55] : memref<2x8x2x96xf32, #tpu.memory_space<vmem>>, vector<1x1x2x96xf32>
    %91 = vector.shape_cast %90 : vector<1x1x2x96xf32> to vector<2x96xf32>
    %92 = vector.shape_cast %88 : vector<2x96xf32> to vector<1x1x2x96xf32>
    tpu.vector_store %arg12[%c1_53, %89, %c0_54, %c0_55], %92 {strides = array<i32>} : memref<2x8x2x96xf32, #tpu.memory_space<vmem>>, vector<1x1x2x96xf32>,
    %93 = vector.extract_strided_slice %86 {offsets = [0, 0], sizes = [2, 96], strides = [1, 1]} : vector<2x192xf32> to vector<2x96xf32>
    %c1_i32 = arith.constant 1 : i32
    %c0_56 = arith.constant 0 : index
    %94 = arith.index_cast %c1_i32 : i32 to index
    %c0_57 = arith.constant 0 : index
    %c0_58 = arith.constant 0 : index
    %95 = vector.load %arg12[%c0_56, %94, %c0_57, %c0_58] : memref<2x8x2x96xf32, #tpu.memory_space<vmem>>, vector<1x1x2x96xf32>
    %96 = vector.shape_cast %95 : vector<1x1x2x96xf32> to vector<2x96xf32>
    %97 = arith.addf %96, %93 : vector<2x96xf32>
    %98 = vector.extract_strided_slice %97 {offsets = [0, 0], sizes = [2, 64], strides = [1, 1]} : vector<2x96xf32> to vector<2x64xf32>
    %99 = arith.negf %98 : vector<2x64xf32>
    %100 = math.exp %99 : vector<2x64xf32>
    %cst_59 = arith.constant 1.000000e+00 : f32
    %101 = vector.broadcast %cst_59 : f32 to vector<2x64xf32>
    %102 = arith.addf %101, %100 : vector<2x64xf32>
    %103 = arith.divf %101, %102 : vector<2x64xf32>
    %104 = vector.extract_strided_slice %103 {offsets = [0, 0], sizes = [2, 32], strides = [1, 1]} : vector<2x64xf32> to vector<2x32xf32>
    %105 = vector.extract_strided_slice %103 {offsets = [0, 32], sizes = [2, 32], strides = [1, 1]} : vector<2x64xf32> to vector<2x32xf32>
    %106 = vector.extract_strided_slice %96 {offsets = [0, 64], sizes = [2, 32], strides = [1, 1]} : vector<2x96xf32> to vector<2x32xf32>
    %107 = vector.extract_strided_slice %93 {offsets = [0, 64], sizes = [2, 32], strides = [1, 1]} : vector<2x96xf32> to vector<2x32xf32>
    %108 = arith.addf %107, %53 : vector<2x32xf32>
    %109 = arith.mulf %104, %108 : vector<2x32xf32>
    %110 = arith.addf %106, %109 : vector<2x32xf32>
    %111 = math.tanh %110 : vector<2x32xf32>
    %cst_60 = arith.constant 1.000000e+00 : f32
    %112 = vector.broadcast %cst_60 : f32 to vector<2x32xf32>
    %113 = arith.subf %112, %105 : vector<2x32xf32>
    %114 = arith.mulf %113, %111 : vector<2x32xf32>
    %115 = arith.mulf %105, %85 : vector<2x32xf32>
    %116 = arith.addf %114, %115 : vector<2x32xf32>
    %cst_61 = arith.constant dense<0.000000e+00> : vector<2x192xf32>
    %117 = tpu.matmul %116, %57, %cst_61 {dimension_numbers = #tpu.dot_dimension_numbers<[1], [0], [0], [1], [0, 0, 1, 1], [], []>} : vector<2x32xf32>, vector<32x192xf32>, vector<2x192xf32> -> vector<2x192xf32>
    %118 = vector.extract_strided_slice %117 {offsets = [0, 96], sizes = [2, 96], strides = [1, 1]} : vector<2x192xf32> to vector<2x96xf32>
    %119 = arith.addf %118, %61 : vector<2x96xf32>
    %c1_62 = arith.constant 1 : index
    %120 = arith.index_cast %c1_i32 : i32 to index
    %c0_63 = arith.constant 0 : index
    %c0_64 = arith.constant 0 : index
    %121 = vector.load %arg12[%c1_62, %120, %c0_63, %c0_64] : memref<2x8x2x96xf32, #tpu.memory_space<vmem>>, vector<1x1x2x96xf32>
    %122 = vector.shape_cast %121 : vector<1x1x2x96xf32> to vector<2x96xf32>
    %123 = vector.shape_cast %119 : vector<2x96xf32> to vector<1x1x2x96xf32>
    tpu.vector_store %arg12[%c1_62, %120, %c0_63, %c0_64], %123 {strides = array<i32>} : memref<2x8x2x96xf32, #tpu.memory_space<vmem>>, vector<1x1x2x96xf32>,
    %124 = vector.extract_strided_slice %117 {offsets = [0, 0], sizes = [2, 96], strides = [1, 1]} : vector<2x192xf32> to vector<2x96xf32>
    %c2_i32 = arith.constant 2 : i32
    %c0_65 = arith.constant 0 : index
    %125 = arith.index_cast %c2_i32 : i32 to index
    %c0_66 = arith.constant 0 : index
    %c0_67 = arith.constant 0 : index
    %126 = vector.load %arg12[%c0_65, %125, %c0_66, %c0_67] : memref<2x8x2x96xf32, #tpu.memory_space<vmem>>, vector<1x1x2x96xf32>
    %127 = vector.shape_cast %126 : vector<1x1x2x96xf32> to vector<2x96xf32>
    %128 = arith.addf %127, %124 : vector<2x96xf32>
    %129 = vector.extract_strided_slice %128 {offsets = [0, 0], sizes = [2, 64], strides = [1, 1]} : vector<2x96xf32> to vector<2x64xf32>
    %130 = arith.negf %129 : vector<2x64xf32>
    %131 = math.exp %130 : vector<2x64xf32>
    %cst_68 = arith.constant 1.000000e+00 : f32
    %132 = vector.broadcast %cst_68 : f32 to vector<2x64xf32>
    %133 = arith.addf %132, %131 : vector<2x64xf32>
    %134 = arith.divf %132, %133 : vector<2x64xf32>
    %135 = vector.extract_strided_slice %134 {offsets = [0, 0], sizes = [2, 32], strides = [1, 1]} : vector<2x64xf32> to vector<2x32xf32>
    %136 = vector.extract_strided_slice %134 {offsets = [0, 32], sizes = [2, 32], strides = [1, 1]} : vector<2x64xf32> to vector<2x32xf32>
    %137 = vector.extract_strided_slice %127 {offsets = [0, 64], sizes = [2, 32], strides = [1, 1]} : vector<2x96xf32> to vector<2x32xf32>
    %138 = vector.extract_strided_slice %124 {offsets = [0, 64], sizes = [2, 32], strides = [1, 1]} : vector<2x96xf32> to vector<2x32xf32>
    %139 = arith.addf %138, %53 : vector<2x32xf32>
    %140 = arith.mulf %135, %139 : vector<2x32xf32>
    %141 = arith.addf %137, %140 : vector<2x32xf32>
    %142 = math.tanh %141 : vector<2x32xf32>
    %cst_69 = arith.constant 1.000000e+00 : f32
    %143 = vector.broadcast %cst_69 : f32 to vector<2x32xf32>
    %144 = arith.subf %143, %136 : vector<2x32xf32>
    %145 = arith.mulf %144, %142 : vector<2x32xf32>
    %146 = arith.mulf %136, %116 : vector<2x32xf32>
    %147 = arith.addf %145, %146 : vector<2x32xf32>
    %cst_70 = arith.constant dense<0.000000e+00> : vector<2x192xf32>
    %148 = tpu.matmul %147, %57, %cst_70 {dimension_numbers = #tpu.dot_dimension_numbers<[1], [0], [0], [1], [0, 0, 1, 1], [], []>} : vector<2x32xf32>, vector<32x192xf32>, vector<2x192xf32> -> vector<2x192xf32>
    %149 = vector.extract_strided_slice %148 {offsets = [0, 96], sizes = [2, 96], strides = [1, 1]} : vector<2x192xf32> to vector<2x96xf32>
    %150 = arith.addf %149, %61 : vector<2x96xf32>
    %c1_71 = arith.constant 1 : index
    %151 = arith.index_cast %c2_i32 : i32 to index
    %c0_72 = arith.constant 0 : index
    %c0_73 = arith.constant 0 : index
    %152 = vector.load %arg12[%c1_71, %151, %c0_72, %c0_73] : memref<2x8x2x96xf32, #tpu.memory_space<vmem>>, vector<1x1x2x96xf32>
    %153 = vector.shape_cast %152 : vector<1x1x2x96xf32> to vector<2x96xf32>
    %154 = vector.shape_cast %150 : vector<2x96xf32> to vector<1x1x2x96xf32>
    tpu.vector_store %arg12[%c1_71, %151, %c0_72, %c0_73], %154 {strides = array<i32>} : memref<2x8x2x96xf32, #tpu.memory_space<vmem>>, vector<1x1x2x96xf32>,
    %155 = vector.extract_strided_slice %148 {offsets = [0, 0], sizes = [2, 96], strides = [1, 1]} : vector<2x192xf32> to vector<2x96xf32>
    %c3_i32 = arith.constant 3 : i32
    %c0_74 = arith.constant 0 : index
    %156 = arith.index_cast %c3_i32 : i32 to index
    %c0_75 = arith.constant 0 : index
    %c0_76 = arith.constant 0 : index
    %157 = vector.load %arg12[%c0_74, %156, %c0_75, %c0_76] : memref<2x8x2x96xf32, #tpu.memory_space<vmem>>, vector<1x1x2x96xf32>
    %158 = vector.shape_cast %157 : vector<1x1x2x96xf32> to vector<2x96xf32>
    %159 = arith.addf %158, %155 : vector<2x96xf32>
    %160 = vector.extract_strided_slice %159 {offsets = [0, 0], sizes = [2, 64], strides = [1, 1]} : vector<2x96xf32> to vector<2x64xf32>
    %161 = arith.negf %160 : vector<2x64xf32>
    %162 = math.exp %161 : vector<2x64xf32>
    %cst_77 = arith.constant 1.000000e+00 : f32
    %163 = vector.broadcast %cst_77 : f32 to vector<2x64xf32>
    %164 = arith.addf %163, %162 : vector<2x64xf32>
    %165 = arith.divf %163, %164 : vector<2x64xf32>
    %166 = vector.extract_strided_slice %165 {offsets = [0, 0], sizes = [2, 32], strides = [1, 1]} : vector<2x64xf32> to vector<2x32xf32>
    %167 = vector.extract_strided_slice %165 {offsets = [0, 32], sizes = [2, 32], strides = [1, 1]} : vector<2x64xf32> to vector<2x32xf32>
    %168 = vector.extract_strided_slice %158 {offsets = [0, 64], sizes = [2, 32], strides = [1, 1]} : vector<2x96xf32> to vector<2x32xf32>
    %169 = vector.extract_strided_slice %155 {offsets = [0, 64], sizes = [2, 32], strides = [1, 1]} : vector<2x96xf32> to vector<2x32xf32>
    %170 = arith.addf %169, %53 : vector<2x32xf32>
    %171 = arith.mulf %166, %170 : vector<2x32xf32>
    %172 = arith.addf %168, %171 : vector<2x32xf32>
    %173 = math.tanh %172 : vector<2x32xf32>
    %cst_78 = arith.constant 1.000000e+00 : f32
    %174 = vector.broadcast %cst_78 : f32 to vector<2x32xf32>
    %175 = arith.subf %174, %167 : vector<2x32xf32>
    %176 = arith.mulf %175, %173 : vector<2x32xf32>
    %177 = arith.mulf %167, %147 : vector<2x32xf32>
    %178 = arith.addf %176, %177 : vector<2x32xf32>
    %cst_79 = arith.constant dense<0.000000e+00> : vector<2x192xf32>
    %179 = tpu.matmul %178, %57, %cst_79 {dimension_numbers = #tpu.dot_dimension_numbers<[1], [0], [0], [1], [0, 0, 1, 1], [], []>} : vector<2x32xf32>, vector<32x192xf32>, vector<2x192xf32> -> vector<2x192xf32>
    %180 = vector.extract_strided_slice %179 {offsets = [0, 96], sizes = [2, 96], strides = [1, 1]} : vector<2x192xf32> to vector<2x96xf32>
    %181 = arith.addf %180, %61 : vector<2x96xf32>
    %c1_80 = arith.constant 1 : index
    %182 = arith.index_cast %c3_i32 : i32 to index
    %c0_81 = arith.constant 0 : index
    %c0_82 = arith.constant 0 : index
    %183 = vector.load %arg12[%c1_80, %182, %c0_81, %c0_82] : memref<2x8x2x96xf32, #tpu.memory_space<vmem>>, vector<1x1x2x96xf32>
    %184 = vector.shape_cast %183 : vector<1x1x2x96xf32> to vector<2x96xf32>
    %185 = vector.shape_cast %181 : vector<2x96xf32> to vector<1x1x2x96xf32>
    tpu.vector_store %arg12[%c1_80, %182, %c0_81, %c0_82], %185 {strides = array<i32>} : memref<2x8x2x96xf32, #tpu.memory_space<vmem>>, vector<1x1x2x96xf32>,
    %186 = vector.extract_strided_slice %179 {offsets = [0, 0], sizes = [2, 96], strides = [1, 1]} : vector<2x192xf32> to vector<2x96xf32>
    %c4_i32 = arith.constant 4 : i32
    %c0_83 = arith.constant 0 : index
    %187 = arith.index_cast %c4_i32 : i32 to index
    %c0_84 = arith.constant 0 : index
    %c0_85 = arith.constant 0 : index
    %188 = vector.load %arg12[%c0_83, %187, %c0_84, %c0_85] : memref<2x8x2x96xf32, #tpu.memory_space<vmem>>, vector<1x1x2x96xf32>
    %189 = vector.shape_cast %188 : vector<1x1x2x96xf32> to vector<2x96xf32>
    %190 = arith.addf %189, %186 : vector<2x96xf32>
    %191 = vector.extract_strided_slice %190 {offsets = [0, 0], sizes = [2, 64], strides = [1, 1]} : vector<2x96xf32> to vector<2x64xf32>
    %192 = arith.negf %191 : vector<2x64xf32>
    %193 = math.exp %192 : vector<2x64xf32>
    %cst_86 = arith.constant 1.000000e+00 : f32
    %194 = vector.broadcast %cst_86 : f32 to vector<2x64xf32>
    %195 = arith.addf %194, %193 : vector<2x64xf32>
    %196 = arith.divf %194, %195 : vector<2x64xf32>
    %197 = vector.extract_strided_slice %196 {offsets = [0, 0], sizes = [2, 32], strides = [1, 1]} : vector<2x64xf32> to vector<2x32xf32>
    %198 = vector.extract_strided_slice %196 {offsets = [0, 32], sizes = [2, 32], strides = [1, 1]} : vector<2x64xf32> to vector<2x32xf32>
    %199 = vector.extract_strided_slice %189 {offsets = [0, 64], sizes = [2, 32], strides = [1, 1]} : vector<2x96xf32> to vector<2x32xf32>
    %200 = vector.extract_strided_slice %186 {offsets = [0, 64], sizes = [2, 32], strides = [1, 1]} : vector<2x96xf32> to vector<2x32xf32>
    %201 = arith.addf %200, %53 : vector<2x32xf32>
    %202 = arith.mulf %197, %201 : vector<2x32xf32>
    %203 = arith.addf %199, %202 : vector<2x32xf32>
    %204 = math.tanh %203 : vector<2x32xf32>
    %cst_87 = arith.constant 1.000000e+00 : f32
    %205 = vector.broadcast %cst_87 : f32 to vector<2x32xf32>
    %206 = arith.subf %205, %198 : vector<2x32xf32>
    %207 = arith.mulf %206, %204 : vector<2x32xf32>
    %208 = arith.mulf %198, %178 : vector<2x32xf32>
    %209 = arith.addf %207, %208 : vector<2x32xf32>
    %cst_88 = arith.constant dense<0.000000e+00> : vector<2x192xf32>
    %210 = tpu.matmul %209, %57, %cst_88 {dimension_numbers = #tpu.dot_dimension_numbers<[1], [0], [0], [1], [0, 0, 1, 1], [], []>} : vector<2x32xf32>, vector<32x192xf32>, vector<2x192xf32> -> vector<2x192xf32>
    %211 = vector.extract_strided_slice %210 {offsets = [0, 96], sizes = [2, 96], strides = [1, 1]} : vector<2x192xf32> to vector<2x96xf32>
    %212 = arith.addf %211, %61 : vector<2x96xf32>
    %c1_89 = arith.constant 1 : index
    %213 = arith.index_cast %c4_i32 : i32 to index
    %c0_90 = arith.constant 0 : index
    %c0_91 = arith.constant 0 : index
    %214 = vector.load %arg12[%c1_89, %213, %c0_90, %c0_91] : memref<2x8x2x96xf32, #tpu.memory_space<vmem>>, vector<1x1x2x96xf32>
    %215 = vector.shape_cast %214 : vector<1x1x2x96xf32> to vector<2x96xf32>
    %216 = vector.shape_cast %212 : vector<2x96xf32> to vector<1x1x2x96xf32>
    tpu.vector_store %arg12[%c1_89, %213, %c0_90, %c0_91], %216 {strides = array<i32>} : memref<2x8x2x96xf32, #tpu.memory_space<vmem>>, vector<1x1x2x96xf32>,
    %217 = vector.extract_strided_slice %210 {offsets = [0, 0], sizes = [2, 96], strides = [1, 1]} : vector<2x192xf32> to vector<2x96xf32>
    %c5_i32 = arith.constant 5 : i32
    %c0_92 = arith.constant 0 : index
    %218 = arith.index_cast %c5_i32 : i32 to index
    %c0_93 = arith.constant 0 : index
    %c0_94 = arith.constant 0 : index
    %219 = vector.load %arg12[%c0_92, %218, %c0_93, %c0_94] : memref<2x8x2x96xf32, #tpu.memory_space<vmem>>, vector<1x1x2x96xf32>
    %220 = vector.shape_cast %219 : vector<1x1x2x96xf32> to vector<2x96xf32>
    %221 = arith.addf %220, %217 : vector<2x96xf32>
    %222 = vector.extract_strided_slice %221 {offsets = [0, 0], sizes = [2, 64], strides = [1, 1]} : vector<2x96xf32> to vector<2x64xf32>
    %223 = arith.negf %222 : vector<2x64xf32>
    %224 = math.exp %223 : vector<2x64xf32>
    %cst_95 = arith.constant 1.000000e+00 : f32
    %225 = vector.broadcast %cst_95 : f32 to vector<2x64xf32>
    %226 = arith.addf %225, %224 : vector<2x64xf32>
    %227 = arith.divf %225, %226 : vector<2x64xf32>
    %228 = vector.extract_strided_slice %227 {offsets = [0, 0], sizes = [2, 32], strides = [1, 1]} : vector<2x64xf32> to vector<2x32xf32>
    %229 = vector.extract_strided_slice %227 {offsets = [0, 32], sizes = [2, 32], strides = [1, 1]} : vector<2x64xf32> to vector<2x32xf32>
    %230 = vector.extract_strided_slice %220 {offsets = [0, 64], sizes = [2, 32], strides = [1, 1]} : vector<2x96xf32> to vector<2x32xf32>
    %231 = vector.extract_strided_slice %217 {offsets = [0, 64], sizes = [2, 32], strides = [1, 1]} : vector<2x96xf32> to vector<2x32xf32>
    %232 = arith.addf %231, %53 : vector<2x32xf32>
    %233 = arith.mulf %228, %232 : vector<2x32xf32>
    %234 = arith.addf %230, %233 : vector<2x32xf32>
    %235 = math.tanh %234 : vector<2x32xf32>
    %cst_96 = arith.constant 1.000000e+00 : f32
    %236 = vector.broadcast %cst_96 : f32 to vector<2x32xf32>
    %237 = arith.subf %236, %229 : vector<2x32xf32>
    %238 = arith.mulf %237, %235 : vector<2x32xf32>
    %239 = arith.mulf %229, %209 : vector<2x32xf32>
    %240 = arith.addf %238, %239 : vector<2x32xf32>
    %cst_97 = arith.constant dense<0.000000e+00> : vector<2x192xf32>
    %241 = tpu.matmul %240, %57, %cst_97 {dimension_numbers = #tpu.dot_dimension_numbers<[1], [0], [0], [1], [0, 0, 1, 1], [], []>} : vector<2x32xf32>, vector<32x192xf32>, vector<2x192xf32> -> vector<2x192xf32>
    %242 = vector.extract_strided_slice %241 {offsets = [0, 96], sizes = [2, 96], strides = [1, 1]} : vector<2x192xf32> to vector<2x96xf32>
    %243 = arith.addf %242, %61 : vector<2x96xf32>
    %c1_98 = arith.constant 1 : index
    %244 = arith.index_cast %c5_i32 : i32 to index
    %c0_99 = arith.constant 0 : index
    %c0_100 = arith.constant 0 : index
    %245 = vector.load %arg12[%c1_98, %244, %c0_99, %c0_100] : memref<2x8x2x96xf32, #tpu.memory_space<vmem>>, vector<1x1x2x96xf32>
    %246 = vector.shape_cast %245 : vector<1x1x2x96xf32> to vector<2x96xf32>
    %247 = vector.shape_cast %243 : vector<2x96xf32> to vector<1x1x2x96xf32>
    tpu.vector_store %arg12[%c1_98, %244, %c0_99, %c0_100], %247 {strides = array<i32>} : memref<2x8x2x96xf32, #tpu.memory_space<vmem>>, vector<1x1x2x96xf32>,
    %248 = vector.extract_strided_slice %241 {offsets = [0, 0], sizes = [2, 96], strides = [1, 1]} : vector<2x192xf32> to vector<2x96xf32>
    %c6_i32 = arith.constant 6 : i32
    %c0_101 = arith.constant 0 : index
    %249 = arith.index_cast %c6_i32 : i32 to index
    %c0_102 = arith.constant 0 : index
    %c0_103 = arith.constant 0 : index
    %250 = vector.load %arg12[%c0_101, %249, %c0_102, %c0_103] : memref<2x8x2x96xf32, #tpu.memory_space<vmem>>, vector<1x1x2x96xf32>
    %251 = vector.shape_cast %250 : vector<1x1x2x96xf32> to vector<2x96xf32>
    %252 = arith.addf %251, %248 : vector<2x96xf32>
    %253 = vector.extract_strided_slice %252 {offsets = [0, 0], sizes = [2, 64], strides = [1, 1]} : vector<2x96xf32> to vector<2x64xf32>
    %254 = arith.negf %253 : vector<2x64xf32>
    %255 = math.exp %254 : vector<2x64xf32>
    %cst_104 = arith.constant 1.000000e+00 : f32
    %256 = vector.broadcast %cst_104 : f32 to vector<2x64xf32>
    %257 = arith.addf %256, %255 : vector<2x64xf32>
    %258 = arith.divf %256, %257 : vector<2x64xf32>
    %259 = vector.extract_strided_slice %258 {offsets = [0, 0], sizes = [2, 32], strides = [1, 1]} : vector<2x64xf32> to vector<2x32xf32>
    %260 = vector.extract_strided_slice %258 {offsets = [0, 32], sizes = [2, 32], strides = [1, 1]} : vector<2x64xf32> to vector<2x32xf32>
    %261 = vector.extract_strided_slice %251 {offsets = [0, 64], sizes = [2, 32], strides = [1, 1]} : vector<2x96xf32> to vector<2x32xf32>
    %262 = vector.extract_strided_slice %248 {offsets = [0, 64], sizes = [2, 32], strides = [1, 1]} : vector<2x96xf32> to vector<2x32xf32>
    %263 = arith.addf %262, %53 : vector<2x32xf32>
    %264 = arith.mulf %259, %263 : vector<2x32xf32>
    %265 = arith.addf %261, %264 : vector<2x32xf32>
    %266 = math.tanh %265 : vector<2x32xf32>
    %cst_105 = arith.constant 1.000000e+00 : f32
    %267 = vector.broadcast %cst_105 : f32 to vector<2x32xf32>
    %268 = arith.subf %267, %260 : vector<2x32xf32>
    %269 = arith.mulf %268, %266 : vector<2x32xf32>
    %270 = arith.mulf %260, %240 : vector<2x32xf32>
    %271 = arith.addf %269, %270 : vector<2x32xf32>
    %cst_106 = arith.constant dense<0.000000e+00> : vector<2x192xf32>
    %272 = tpu.matmul %271, %57, %cst_106 {dimension_numbers = #tpu.dot_dimension_numbers<[1], [0], [0], [1], [0, 0, 1, 1], [], []>} : vector<2x32xf32>, vector<32x192xf32>, vector<2x192xf32> -> vector<2x192xf32>
    %273 = vector.extract_strided_slice %272 {offsets = [0, 96], sizes = [2, 96], strides = [1, 1]} : vector<2x192xf32> to vector<2x96xf32>
    %274 = arith.addf %273, %61 : vector<2x96xf32>
    %c1_107 = arith.constant 1 : index
    %275 = arith.index_cast %c6_i32 : i32 to index
    %c0_108 = arith.constant 0 : index
    %c0_109 = arith.constant 0 : index
    %276 = vector.load %arg12[%c1_107, %275, %c0_108, %c0_109] : memref<2x8x2x96xf32, #tpu.memory_space<vmem>>, vector<1x1x2x96xf32>
    %277 = vector.shape_cast %276 : vector<1x1x2x96xf32> to vector<2x96xf32>
    %278 = vector.shape_cast %274 : vector<2x96xf32> to vector<1x1x2x96xf32>
    tpu.vector_store %arg12[%c1_107, %275, %c0_108, %c0_109], %278 {strides = array<i32>} : memref<2x8x2x96xf32, #tpu.memory_space<vmem>>, vector<1x1x2x96xf32>,
    %279 = vector.extract_strided_slice %272 {offsets = [0, 0], sizes = [2, 96], strides = [1, 1]} : vector<2x192xf32> to vector<2x96xf32>
    %c7_i32 = arith.constant 7 : i32
    %c0_110 = arith.constant 0 : index
    %280 = arith.index_cast %c7_i32 : i32 to index
    %c0_111 = arith.constant 0 : index
    %c0_112 = arith.constant 0 : index
    %281 = vector.load %arg12[%c0_110, %280, %c0_111, %c0_112] : memref<2x8x2x96xf32, #tpu.memory_space<vmem>>, vector<1x1x2x96xf32>
    %282 = vector.shape_cast %281 : vector<1x1x2x96xf32> to vector<2x96xf32>
    %283 = arith.addf %282, %279 : vector<2x96xf32>
    %284 = vector.extract_strided_slice %283 {offsets = [0, 0], sizes = [2, 64], strides = [1, 1]} : vector<2x96xf32> to vector<2x64xf32>
    %285 = arith.negf %284 : vector<2x64xf32>
    %286 = math.exp %285 : vector<2x64xf32>
    %cst_113 = arith.constant 1.000000e+00 : f32
    %287 = vector.broadcast %cst_113 : f32 to vector<2x64xf32>
    %288 = arith.addf %287, %286 : vector<2x64xf32>
    %289 = arith.divf %287, %288 : vector<2x64xf32>
    %290 = vector.extract_strided_slice %289 {offsets = [0, 0], sizes = [2, 32], strides = [1, 1]} : vector<2x64xf32> to vector<2x32xf32>
    %291 = vector.extract_strided_slice %289 {offsets = [0, 32], sizes = [2, 32], strides = [1, 1]} : vector<2x64xf32> to vector<2x32xf32>
    %292 = vector.extract_strided_slice %282 {offsets = [0, 64], sizes = [2, 32], strides = [1, 1]} : vector<2x96xf32> to vector<2x32xf32>
    %293 = vector.extract_strided_slice %279 {offsets = [0, 64], sizes = [2, 32], strides = [1, 1]} : vector<2x96xf32> to vector<2x32xf32>
    %294 = arith.addf %293, %53 : vector<2x32xf32>
    %295 = arith.mulf %290, %294 : vector<2x32xf32>
    %296 = arith.addf %292, %295 : vector<2x32xf32>
    %297 = math.tanh %296 : vector<2x32xf32>
    %cst_114 = arith.constant 1.000000e+00 : f32
    %298 = vector.broadcast %cst_114 : f32 to vector<2x32xf32>
    %299 = arith.subf %298, %291 : vector<2x32xf32>
    %300 = arith.mulf %299, %297 : vector<2x32xf32>
    %301 = arith.mulf %291, %271 : vector<2x32xf32>
    %302 = arith.addf %300, %301 : vector<2x32xf32>
    %cst_115 = arith.constant dense<0.000000e+00> : vector<2x192xf32>
    %303 = tpu.matmul %302, %57, %cst_115 {dimension_numbers = #tpu.dot_dimension_numbers<[1], [0], [0], [1], [0, 0, 1, 1], [], []>} : vector<2x32xf32>, vector<32x192xf32>, vector<2x192xf32> -> vector<2x192xf32>
    %304 = vector.extract_strided_slice %303 {offsets = [0, 96], sizes = [2, 96], strides = [1, 1]} : vector<2x192xf32> to vector<2x96xf32>
    %305 = arith.addf %304, %61 : vector<2x96xf32>
    %c1_116 = arith.constant 1 : index
    %306 = arith.index_cast %c7_i32 : i32 to index
    %c0_117 = arith.constant 0 : index
    %c0_118 = arith.constant 0 : index
    %307 = vector.load %arg12[%c1_116, %306, %c0_117, %c0_118] : memref<2x8x2x96xf32, #tpu.memory_space<vmem>>, vector<1x1x2x96xf32>
    %308 = vector.shape_cast %307 : vector<1x1x2x96xf32> to vector<2x96xf32>
    %309 = vector.shape_cast %305 : vector<2x96xf32> to vector<1x1x2x96xf32>
    tpu.vector_store %arg12[%c1_116, %306, %c0_117, %c0_118], %309 {strides = array<i32>} : memref<2x8x2x96xf32, #tpu.memory_space<vmem>>, vector<1x1x2x96xf32>,
    %310 = vector.extract_strided_slice %303 {offsets = [0, 0], sizes = [2, 96], strides = [1, 1]} : vector<2x192xf32> to vector<2x96xf32>
    %c8_i32 = arith.constant 8 : i32
    %c0_119 = arith.constant 0 : index
    %c0_120 = arith.constant 0 : index
    %c0_121 = arith.constant 0 : index
    %311 = vector.load %arg11[%c0_119, %c0_120, %c0_121] : memref<2x2x32xf32, #tpu.memory_space<vmem>>, vector<1x2x32xf32>
    %312 = vector.shape_cast %311 : vector<1x2x32xf32> to vector<2x32xf32>
    %313 = vector.shape_cast %302 : vector<2x32xf32> to vector<1x2x32xf32>
    tpu.vector_store %arg11[%c0_119, %c0_120, %c0_121], %313 {strides = array<i32>} : memref<2x2x32xf32, #tpu.memory_space<vmem>>, vector<1x2x32xf32>,
    %c1_122 = arith.constant 1 : index
    %c0_123 = arith.constant 0 : index
    %c0_124 = arith.constant 0 : index
    %314 = vector.load %arg4[%c1_122, %c0_123, %c0_124] : memref<2x32x96xf32, #tpu.memory_space<vmem>>, vector<1x32x96xf32>
    %315 = vector.shape_cast %314 : vector<1x32x96xf32> to vector<32x96xf32>
    %c1_125 = arith.constant 1 : index
    %c0_126 = arith.constant 0 : index
    %c0_127 = arith.constant 0 : index
    %316 = vector.load %arg7[%c1_125, %c0_126, %c0_127] : memref<2x1x32xf32, #tpu.memory_space<vmem>>, vector<1x1x32xf32>
    %317 = vector.shape_cast %316 : vector<1x1x32xf32> to vector<1x32xf32>
    %318 = vector.shape_cast %317 : vector<1x32xf32> to vector<1x32xf32>
    %319 = vector.broadcast %318 : vector<1x32xf32> to vector<2x32xf32>
    %c1_128 = arith.constant 1 : index
    %c0_129 = arith.constant 0 : index
    %c0_130 = arith.constant 0 : index
    %320 = vector.load %arg1[%c1_128, %c0_129, %c0_130] : memref<2x2x32xf32, #tpu.memory_space<vmem>>, vector<1x2x32xf32>
    %321 = vector.shape_cast %320 : vector<1x2x32xf32> to vector<2x32xf32>
    %c0_i32_131 = arith.constant 0 : i32
    %c1_132 = arith.constant 1 : index
    %322 = arith.index_cast %c0_i32_131 : i32 to index
    %c0_133 = arith.constant 0 : index
    %c0_134 = arith.constant 0 : index
    %323 = vector.load %arg12[%c1_132, %322, %c0_133, %c0_134] : memref<2x8x2x96xf32, #tpu.memory_space<vmem>>, vector<1x1x2x96xf32>
    %324 = vector.shape_cast %323 : vector<1x1x2x96xf32> to vector<2x96xf32>
    %cst_135 = arith.constant dense<0.000000e+00> : vector<2x96xf32>
    %325 = tpu.matmul %321, %315, %cst_135 {dimension_numbers = #tpu.dot_dimension_numbers<[1], [0], [0], [1], [0, 0, 1, 1], [], []>} : vector<2x32xf32>, vector<32x96xf32>, vector<2x96xf32> -> vector<2x96xf32>
    %326 = arith.addf %324, %325 : vector<2x96xf32>
    %327 = vector.extract_strided_slice %326 {offsets = [0, 0], sizes = [2, 64], strides = [1, 1]} : vector<2x96xf32> to vector<2x64xf32>
    %328 = arith.negf %327 : vector<2x64xf32>
    %329 = math.exp %328 : vector<2x64xf32>
    %cst_136 = arith.constant 1.000000e+00 : f32
    %330 = vector.broadcast %cst_136 : f32 to vector<2x64xf32>
    %331 = arith.addf %330, %329 : vector<2x64xf32>
    %332 = arith.divf %330, %331 : vector<2x64xf32>
    %333 = vector.extract_strided_slice %332 {offsets = [0, 0], sizes = [2, 32], strides = [1, 1]} : vector<2x64xf32> to vector<2x32xf32>
    %334 = vector.extract_strided_slice %332 {offsets = [0, 32], sizes = [2, 32], strides = [1, 1]} : vector<2x64xf32> to vector<2x32xf32>
    %335 = vector.extract_strided_slice %324 {offsets = [0, 64], sizes = [2, 32], strides = [1, 1]} : vector<2x96xf32> to vector<2x32xf32>
    %336 = vector.extract_strided_slice %325 {offsets = [0, 64], sizes = [2, 32], strides = [1, 1]} : vector<2x96xf32> to vector<2x32xf32>
    %337 = arith.addf %336, %319 : vector<2x32xf32>
    %338 = arith.mulf %333, %337 : vector<2x32xf32>
    %339 = arith.addf %335, %338 : vector<2x32xf32>
    %340 = math.tanh %339 : vector<2x32xf32>
    %cst_137 = arith.constant 1.000000e+00 : f32
    %341 = vector.broadcast %cst_137 : f32 to vector<2x32xf32>
    %342 = arith.subf %341, %334 : vector<2x32xf32>
    %343 = arith.mulf %342, %340 : vector<2x32xf32>
    %344 = arith.mulf %334, %321 : vector<2x32xf32>
    %345 = arith.addf %343, %344 : vector<2x32xf32>
    %c1_i32_138 = arith.constant 1 : i32
    %c1_139 = arith.constant 1 : index
    %346 = arith.index_cast %c1_i32_138 : i32 to index
    %c0_140 = arith.constant 0 : index
    %c0_141 = arith.constant 0 : index
    %347 = vector.load %arg12[%c1_139, %346, %c0_140, %c0_141] : memref<2x8x2x96xf32, #tpu.memory_space<vmem>>, vector<1x1x2x96xf32>
    %348 = vector.shape_cast %347 : vector<1x1x2x96xf32> to vector<2x96xf32>
    %cst_142 = arith.constant dense<0.000000e+00> : vector<2x96xf32>
    %349 = tpu.matmul %345, %315, %cst_142 {dimension_numbers = #tpu.dot_dimension_numbers<[1], [0], [0], [1], [0, 0, 1, 1], [], []>} : vector<2x32xf32>, vector<32x96xf32>, vector<2x96xf32> -> vector<2x96xf32>
    %350 = arith.addf %348, %349 : vector<2x96xf32>
    %351 = vector.extract_strided_slice %350 {offsets = [0, 0], sizes = [2, 64], strides = [1, 1]} : vector<2x96xf32> to vector<2x64xf32>
    %352 = arith.negf %351 : vector<2x64xf32>
    %353 = math.exp %352 : vector<2x64xf32>
    %cst_143 = arith.constant 1.000000e+00 : f32
    %354 = vector.broadcast %cst_143 : f32 to vector<2x64xf32>
    %355 = arith.addf %354, %353 : vector<2x64xf32>
    %356 = arith.divf %354, %355 : vector<2x64xf32>
    %357 = vector.extract_strided_slice %356 {offsets = [0, 0], sizes = [2, 32], strides = [1, 1]} : vector<2x64xf32> to vector<2x32xf32>
    %358 = vector.extract_strided_slice %356 {offsets = [0, 32], sizes = [2, 32], strides = [1, 1]} : vector<2x64xf32> to vector<2x32xf32>
    %359 = vector.extract_strided_slice %348 {offsets = [0, 64], sizes = [2, 32], strides = [1, 1]} : vector<2x96xf32> to vector<2x32xf32>
    %360 = vector.extract_strided_slice %349 {offsets = [0, 64], sizes = [2, 32], strides = [1, 1]} : vector<2x96xf32> to vector<2x32xf32>
    %361 = arith.addf %360, %319 : vector<2x32xf32>
    %362 = arith.mulf %357, %361 : vector<2x32xf32>
    %363 = arith.addf %359, %362 : vector<2x32xf32>
    %364 = math.tanh %363 : vector<2x32xf32>
    %cst_144 = arith.constant 1.000000e+00 : f32
    %365 = vector.broadcast %cst_144 : f32 to vector<2x32xf32>
    %366 = arith.subf %365, %358 : vector<2x32xf32>
    %367 = arith.mulf %366, %364 : vector<2x32xf32>
    %368 = arith.mulf %358, %345 : vector<2x32xf32>
    %369 = arith.addf %367, %368 : vector<2x32xf32>
    %c2_i32_145 = arith.constant 2 : i32
    %c1_146 = arith.constant 1 : index
    %370 = arith.index_cast %c2_i32_145 : i32 to index
    %c0_147 = arith.constant 0 : index
    %c0_148 = arith.constant 0 : index
    %371 = vector.load %arg12[%c1_146, %370, %c0_147, %c0_148] : memref<2x8x2x96xf32, #tpu.memory_space<vmem>>, vector<1x1x2x96xf32>
    %372 = vector.shape_cast %371 : vector<1x1x2x96xf32> to vector<2x96xf32>
    %cst_149 = arith.constant dense<0.000000e+00> : vector<2x96xf32>
    %373 = tpu.matmul %369, %315, %cst_149 {dimension_numbers = #tpu.dot_dimension_numbers<[1], [0], [0], [1], [0, 0, 1, 1], [], []>} : vector<2x32xf32>, vector<32x96xf32>, vector<2x96xf32> -> vector<2x96xf32>
    %374 = arith.addf %372, %373 : vector<2x96xf32>
    %375 = vector.extract_strided_slice %374 {offsets = [0, 0], sizes = [2, 64], strides = [1, 1]} : vector<2x96xf32> to vector<2x64xf32>
    %376 = arith.negf %375 : vector<2x64xf32>
    %377 = math.exp %376 : vector<2x64xf32>
    %cst_150 = arith.constant 1.000000e+00 : f32
    %378 = vector.broadcast %cst_150 : f32 to vector<2x64xf32>
    %379 = arith.addf %378, %377 : vector<2x64xf32>
    %380 = arith.divf %378, %379 : vector<2x64xf32>
    %381 = vector.extract_strided_slice %380 {offsets = [0, 0], sizes = [2, 32], strides = [1, 1]} : vector<2x64xf32> to vector<2x32xf32>
    %382 = vector.extract_strided_slice %380 {offsets = [0, 32], sizes = [2, 32], strides = [1, 1]} : vector<2x64xf32> to vector<2x32xf32>
    %383 = vector.extract_strided_slice %372 {offsets = [0, 64], sizes = [2, 32], strides = [1, 1]} : vector<2x96xf32> to vector<2x32xf32>
    %384 = vector.extract_strided_slice %373 {offsets = [0, 64], sizes = [2, 32], strides = [1, 1]} : vector<2x96xf32> to vector<2x32xf32>
    %385 = arith.addf %384, %319 : vector<2x32xf32>
    %386 = arith.mulf %381, %385 : vector<2x32xf32>
    %387 = arith.addf %383, %386 : vector<2x32xf32>
    %388 = math.tanh %387 : vector<2x32xf32>
    %cst_151 = arith.constant 1.000000e+00 : f32
    %389 = vector.broadcast %cst_151 : f32 to vector<2x32xf32>
    %390 = arith.subf %389, %382 : vector<2x32xf32>
    %391 = arith.mulf %390, %388 : vector<2x32xf32>
    %392 = arith.mulf %382, %369 : vector<2x32xf32>
    %393 = arith.addf %391, %392 : vector<2x32xf32>
    %c3_i32_152 = arith.constant 3 : i32
    %c1_153 = arith.constant 1 : index
    %394 = arith.index_cast %c3_i32_152 : i32 to index
    %c0_154 = arith.constant 0 : index
    %c0_155 = arith.constant 0 : index
    %395 = vector.load %arg12[%c1_153, %394, %c0_154, %c0_155] : memref<2x8x2x96xf32, #tpu.memory_space<vmem>>, vector<1x1x2x96xf32>
    %396 = vector.shape_cast %395 : vector<1x1x2x96xf32> to vector<2x96xf32>
    %cst_156 = arith.constant dense<0.000000e+00> : vector<2x96xf32>
    %397 = tpu.matmul %393, %315, %cst_156 {dimension_numbers = #tpu.dot_dimension_numbers<[1], [0], [0], [1], [0, 0, 1, 1], [], []>} : vector<2x32xf32>, vector<32x96xf32>, vector<2x96xf32> -> vector<2x96xf32>
    %398 = arith.addf %396, %397 : vector<2x96xf32>
    %399 = vector.extract_strided_slice %398 {offsets = [0, 0], sizes = [2, 64], strides = [1, 1]} : vector<2x96xf32> to vector<2x64xf32>
    %400 = arith.negf %399 : vector<2x64xf32>
    %401 = math.exp %400 : vector<2x64xf32>
    %cst_157 = arith.constant 1.000000e+00 : f32
    %402 = vector.broadcast %cst_157 : f32 to vector<2x64xf32>
    %403 = arith.addf %402, %401 : vector<2x64xf32>
    %404 = arith.divf %402, %403 : vector<2x64xf32>
    %405 = vector.extract_strided_slice %404 {offsets = [0, 0], sizes = [2, 32], strides = [1, 1]} : vector<2x64xf32> to vector<2x32xf32>
    %406 = vector.extract_strided_slice %404 {offsets = [0, 32], sizes = [2, 32], strides = [1, 1]} : vector<2x64xf32> to vector<2x32xf32>
    %407 = vector.extract_strided_slice %396 {offsets = [0, 64], sizes = [2, 32], strides = [1, 1]} : vector<2x96xf32> to vector<2x32xf32>
    %408 = vector.extract_strided_slice %397 {offsets = [0, 64], sizes = [2, 32], strides = [1, 1]} : vector<2x96xf32> to vector<2x32xf32>
    %409 = arith.addf %408, %319 : vector<2x32xf32>
    %410 = arith.mulf %405, %409 : vector<2x32xf32>
    %411 = arith.addf %407, %410 : vector<2x32xf32>
    %412 = math.tanh %411 : vector<2x32xf32>
    %cst_158 = arith.constant 1.000000e+00 : f32
    %413 = vector.broadcast %cst_158 : f32 to vector<2x32xf32>
    %414 = arith.subf %413, %406 : vector<2x32xf32>
    %415 = arith.mulf %414, %412 : vector<2x32xf32>
    %416 = arith.mulf %406, %393 : vector<2x32xf32>
    %417 = arith.addf %415, %416 : vector<2x32xf32>
    %c4_i32_159 = arith.constant 4 : i32
    %c1_160 = arith.constant 1 : index
    %418 = arith.index_cast %c4_i32_159 : i32 to index
    %c0_161 = arith.constant 0 : index
    %c0_162 = arith.constant 0 : index
    %419 = vector.load %arg12[%c1_160, %418, %c0_161, %c0_162] : memref<2x8x2x96xf32, #tpu.memory_space<vmem>>, vector<1x1x2x96xf32>
    %420 = vector.shape_cast %419 : vector<1x1x2x96xf32> to vector<2x96xf32>
    %cst_163 = arith.constant dense<0.000000e+00> : vector<2x96xf32>
    %421 = tpu.matmul %417, %315, %cst_163 {dimension_numbers = #tpu.dot_dimension_numbers<[1], [0], [0], [1], [0, 0, 1, 1], [], []>} : vector<2x32xf32>, vector<32x96xf32>, vector<2x96xf32> -> vector<2x96xf32>
    %422 = arith.addf %420, %421 : vector<2x96xf32>
    %423 = vector.extract_strided_slice %422 {offsets = [0, 0], sizes = [2, 64], strides = [1, 1]} : vector<2x96xf32> to vector<2x64xf32>
    %424 = arith.negf %423 : vector<2x64xf32>
    %425 = math.exp %424 : vector<2x64xf32>
    %cst_164 = arith.constant 1.000000e+00 : f32
    %426 = vector.broadcast %cst_164 : f32 to vector<2x64xf32>
    %427 = arith.addf %426, %425 : vector<2x64xf32>
    %428 = arith.divf %426, %427 : vector<2x64xf32>
    %429 = vector.extract_strided_slice %428 {offsets = [0, 0], sizes = [2, 32], strides = [1, 1]} : vector<2x64xf32> to vector<2x32xf32>
    %430 = vector.extract_strided_slice %428 {offsets = [0, 32], sizes = [2, 32], strides = [1, 1]} : vector<2x64xf32> to vector<2x32xf32>
    %431 = vector.extract_strided_slice %420 {offsets = [0, 64], sizes = [2, 32], strides = [1, 1]} : vector<2x96xf32> to vector<2x32xf32>
    %432 = vector.extract_strided_slice %421 {offsets = [0, 64], sizes = [2, 32], strides = [1, 1]} : vector<2x96xf32> to vector<2x32xf32>
    %433 = arith.addf %432, %319 : vector<2x32xf32>
    %434 = arith.mulf %429, %433 : vector<2x32xf32>
    %435 = arith.addf %431, %434 : vector<2x32xf32>
    %436 = math.tanh %435 : vector<2x32xf32>
    %cst_165 = arith.constant 1.000000e+00 : f32
    %437 = vector.broadcast %cst_165 : f32 to vector<2x32xf32>
    %438 = arith.subf %437, %430 : vector<2x32xf32>
    %439 = arith.mulf %438, %436 : vector<2x32xf32>
    %440 = arith.mulf %430, %417 : vector<2x32xf32>
    %441 = arith.addf %439, %440 : vector<2x32xf32>
    %c5_i32_166 = arith.constant 5 : i32
    %c1_167 = arith.constant 1 : index
    %442 = arith.index_cast %c5_i32_166 : i32 to index
    %c0_168 = arith.constant 0 : index
    %c0_169 = arith.constant 0 : index
    %443 = vector.load %arg12[%c1_167, %442, %c0_168, %c0_169] : memref<2x8x2x96xf32, #tpu.memory_space<vmem>>, vector<1x1x2x96xf32>
    %444 = vector.shape_cast %443 : vector<1x1x2x96xf32> to vector<2x96xf32>
    %cst_170 = arith.constant dense<0.000000e+00> : vector<2x96xf32>
    %445 = tpu.matmul %441, %315, %cst_170 {dimension_numbers = #tpu.dot_dimension_numbers<[1], [0], [0], [1], [0, 0, 1, 1], [], []>} : vector<2x32xf32>, vector<32x96xf32>, vector<2x96xf32> -> vector<2x96xf32>
    %446 = arith.addf %444, %445 : vector<2x96xf32>
    %447 = vector.extract_strided_slice %446 {offsets = [0, 0], sizes = [2, 64], strides = [1, 1]} : vector<2x96xf32> to vector<2x64xf32>
    %448 = arith.negf %447 : vector<2x64xf32>
    %449 = math.exp %448 : vector<2x64xf32>
    %cst_171 = arith.constant 1.000000e+00 : f32
    %450 = vector.broadcast %cst_171 : f32 to vector<2x64xf32>
    %451 = arith.addf %450, %449 : vector<2x64xf32>
    %452 = arith.divf %450, %451 : vector<2x64xf32>
    %453 = vector.extract_strided_slice %452 {offsets = [0, 0], sizes = [2, 32], strides = [1, 1]} : vector<2x64xf32> to vector<2x32xf32>
    %454 = vector.extract_strided_slice %452 {offsets = [0, 32], sizes = [2, 32], strides = [1, 1]} : vector<2x64xf32> to vector<2x32xf32>
    %455 = vector.extract_strided_slice %444 {offsets = [0, 64], sizes = [2, 32], strides = [1, 1]} : vector<2x96xf32> to vector<2x32xf32>
    %456 = vector.extract_strided_slice %445 {offsets = [0, 64], sizes = [2, 32], strides = [1, 1]} : vector<2x96xf32> to vector<2x32xf32>
    %457 = arith.addf %456, %319 : vector<2x32xf32>
    %458 = arith.mulf %453, %457 : vector<2x32xf32>
    %459 = arith.addf %455, %458 : vector<2x32xf32>
    %460 = math.tanh %459 : vector<2x32xf32>
    %cst_172 = arith.constant 1.000000e+00 : f32
    %461 = vector.broadcast %cst_172 : f32 to vector<2x32xf32>
    %462 = arith.subf %461, %454 : vector<2x32xf32>
    %463 = arith.mulf %462, %460 : vector<2x32xf32>
    %464 = arith.mulf %454, %441 : vector<2x32xf32>
    %465 = arith.addf %463, %464 : vector<2x32xf32>
    %c6_i32_173 = arith.constant 6 : i32
    %c1_174 = arith.constant 1 : index
    %466 = arith.index_cast %c6_i32_173 : i32 to index
    %c0_175 = arith.constant 0 : index
    %c0_176 = arith.constant 0 : index
    %467 = vector.load %arg12[%c1_174, %466, %c0_175, %c0_176] : memref<2x8x2x96xf32, #tpu.memory_space<vmem>>, vector<1x1x2x96xf32>
    %468 = vector.shape_cast %467 : vector<1x1x2x96xf32> to vector<2x96xf32>
    %cst_177 = arith.constant dense<0.000000e+00> : vector<2x96xf32>
    %469 = tpu.matmul %465, %315, %cst_177 {dimension_numbers = #tpu.dot_dimension_numbers<[1], [0], [0], [1], [0, 0, 1, 1], [], []>} : vector<2x32xf32>, vector<32x96xf32>, vector<2x96xf32> -> vector<2x96xf32>
    %470 = arith.addf %468, %469 : vector<2x96xf32>
    %471 = vector.extract_strided_slice %470 {offsets = [0, 0], sizes = [2, 64], strides = [1, 1]} : vector<2x96xf32> to vector<2x64xf32>
    %472 = arith.negf %471 : vector<2x64xf32>
    %473 = math.exp %472 : vector<2x64xf32>
    %cst_178 = arith.constant 1.000000e+00 : f32
    %474 = vector.broadcast %cst_178 : f32 to vector<2x64xf32>
    %475 = arith.addf %474, %473 : vector<2x64xf32>
    %476 = arith.divf %474, %475 : vector<2x64xf32>
    %477 = vector.extract_strided_slice %476 {offsets = [0, 0], sizes = [2, 32], strides = [1, 1]} : vector<2x64xf32> to vector<2x32xf32>
    %478 = vector.extract_strided_slice %476 {offsets = [0, 32], sizes = [2, 32], strides = [1, 1]} : vector<2x64xf32> to vector<2x32xf32>
    %479 = vector.extract_strided_slice %468 {offsets = [0, 64], sizes = [2, 32], strides = [1, 1]} : vector<2x96xf32> to vector<2x32xf32>
    %480 = vector.extract_strided_slice %469 {offsets = [0, 64], sizes = [2, 32], strides = [1, 1]} : vector<2x96xf32> to vector<2x32xf32>
    %481 = arith.addf %480, %319 : vector<2x32xf32>
    %482 = arith.mulf %477, %481 : vector<2x32xf32>
    %483 = arith.addf %479, %482 : vector<2x32xf32>
    %484 = math.tanh %483 : vector<2x32xf32>
    %cst_179 = arith.constant 1.000000e+00 : f32
    %485 = vector.broadcast %cst_179 : f32 to vector<2x32xf32>
    %486 = arith.subf %485, %478 : vector<2x32xf32>
    %487 = arith.mulf %486, %484 : vector<2x32xf32>
    %488 = arith.mulf %478, %465 : vector<2x32xf32>
    %489 = arith.addf %487, %488 : vector<2x32xf32>
    %c7_i32_180 = arith.constant 7 : i32
    %c1_181 = arith.constant 1 : index
    %490 = arith.index_cast %c7_i32_180 : i32 to index
    %c0_182 = arith.constant 0 : index
    %c0_183 = arith.constant 0 : index
    %491 = vector.load %arg12[%c1_181, %490, %c0_182, %c0_183] : memref<2x8x2x96xf32, #tpu.memory_space<vmem>>, vector<1x1x2x96xf32>
    %492 = vector.shape_cast %491 : vector<1x1x2x96xf32> to vector<2x96xf32>
    %cst_184 = arith.constant dense<0.000000e+00> : vector<2x96xf32>
    %493 = tpu.matmul %489, %315, %cst_184 {dimension_numbers = #tpu.dot_dimension_numbers<[1], [0], [0], [1], [0, 0, 1, 1], [], []>} : vector<2x32xf32>, vector<32x96xf32>, vector<2x96xf32> -> vector<2x96xf32>
    %494 = arith.addf %492, %493 : vector<2x96xf32>
    %495 = vector.extract_strided_slice %494 {offsets = [0, 0], sizes = [2, 64], strides = [1, 1]} : vector<2x96xf32> to vector<2x64xf32>
    %496 = arith.negf %495 : vector<2x64xf32>
    %497 = math.exp %496 : vector<2x64xf32>
    %cst_185 = arith.constant 1.000000e+00 : f32
    %498 = vector.broadcast %cst_185 : f32 to vector<2x64xf32>
    %499 = arith.addf %498, %497 : vector<2x64xf32>
    %500 = arith.divf %498, %499 : vector<2x64xf32>
    %501 = vector.extract_strided_slice %500 {offsets = [0, 0], sizes = [2, 32], strides = [1, 1]} : vector<2x64xf32> to vector<2x32xf32>
    %502 = vector.extract_strided_slice %500 {offsets = [0, 32], sizes = [2, 32], strides = [1, 1]} : vector<2x64xf32> to vector<2x32xf32>
    %503 = vector.extract_strided_slice %492 {offsets = [0, 64], sizes = [2, 32], strides = [1, 1]} : vector<2x96xf32> to vector<2x32xf32>
    %504 = vector.extract_strided_slice %493 {offsets = [0, 64], sizes = [2, 32], strides = [1, 1]} : vector<2x96xf32> to vector<2x32xf32>
    %505 = arith.addf %504, %319 : vector<2x32xf32>
    %506 = arith.mulf %501, %505 : vector<2x32xf32>
    %507 = arith.addf %503, %506 : vector<2x32xf32>
    %508 = math.tanh %507 : vector<2x32xf32>
    %cst_186 = arith.constant 1.000000e+00 : f32
    %509 = vector.broadcast %cst_186 : f32 to vector<2x32xf32>
    %510 = arith.subf %509, %502 : vector<2x32xf32>
    %511 = arith.mulf %510, %508 : vector<2x32xf32>
    %512 = arith.mulf %502, %489 : vector<2x32xf32>
    %513 = arith.addf %511, %512 : vector<2x32xf32>
    %c8_i32_187 = arith.constant 8 : i32
    %c1_188 = arith.constant 1 : index
    %c0_189 = arith.constant 0 : index
    %c0_190 = arith.constant 0 : index
    %514 = vector.load %arg11[%c1_188, %c0_189, %c0_190] : memref<2x2x32xf32, #tpu.memory_space<vmem>>, vector<1x2x32xf32>
    %515 = vector.shape_cast %514 : vector<1x2x32xf32> to vector<2x32xf32>
    %516 = vector.shape_cast %513 : vector<2x32xf32> to vector<1x2x32xf32>
    tpu.vector_store %arg11[%c1_188, %c0_189, %c0_190], %516 {strides = array<i32>} : memref<2x2x32xf32, #tpu.memory_space<vmem>>, vector<1x2x32xf32>,
    %cst_191 = arith.constant 0.000000e+00 : f32
    %517 = vector.broadcast %cst_191 : f32 to vector<2x32xf32>
    %518 = arith.maximumf %513, %517 : vector<2x32xf32>
    %c0_192 = arith.constant 0 : index
    %c0_193 = arith.constant 0 : index
    %519 = vector.load %arg8[%c0_192, %c0_193] : memref<32x4xf32, #tpu.memory_space<vmem>>, vector<32x4xf32>
    %cst_194 = arith.constant dense<0.000000e+00> : vector<2x4xf32>
    %520 = tpu.matmul %518, %519, %cst_194 {dimension_numbers = #tpu.dot_dimension_numbers<[1], [0], [0], [1], [0, 0, 1, 1], [], []>} : vector<2x32xf32>, vector<32x4xf32>, vector<2x4xf32> -> vector<2x4xf32>
    %c0_195 = arith.constant 0 : index
    %c0_196 = arith.constant 0 : index
    %521 = vector.load %arg9[%c0_195, %c0_196] : memref<1x4xf32, #tpu.memory_space<vmem>>, vector<1x4xf32>
    %522 = vector.broadcast %521 : vector<1x4xf32> to vector<2x4xf32>
    %523 = arith.addf %520, %522 : vector<2x4xf32>
    %c0_197 = arith.constant 0 : index
    %c0_198 = arith.constant 0 : index
    %524 = vector.load %arg10[%c0_197, %c0_198] : memref<2x4xf32, #tpu.memory_space<vmem>>, vector<2x4xf32>
    tpu.vector_store %arg10[%c0_197, %c0_198], %523 {strides = array<i32>} : memref<2x4xf32, #tpu.memory_space<vmem>>, vector<2x4xf32>,
    return
  }
}

</mosaic_0001>

<bundles_post_ra>
// kernel: grunet_forward.1
= control target key start
LH: loop header
LB: loop body
LE: loop exit
PB: predicated region body
PF: predicated region fallthrough
CT: control target
= control target key end

     0   :  { %17 = vsyncpa [#allocation4], 0  ;;  %s3400_s0 = inlined_call_operand.vmem [shape: f32[2,8,4], index: 0, kind: input, shape index: {}]   ;;  %s3401_s1 = inlined_call_operand.hbm [shape: f32[2,2,32], index: 1, kind: input, shape index: {}, may-alias: {1,11}]   ;;  %s3402_s2 = inlined_call_operand.hbm [shape: f32[4,96], index: 2, kind: input, shape index: {}]   ;;  %s3403_s3 = inlined_call_operand.vmem [shape: f32[1,96], index: 3, kind: input, shape index: {}]   ;;  %s3404_s4 = inlined_call_operand.vmem [shape: f32[2,32,96], index: 4, kind: input, shape index: {}]   ;;  %s3405_s5 = inlined_call_operand.hbm [shape: f32[1,32,192], index: 5, kind: input, shape index: {}]   ;;  %s3406_s6 = inlined_call_operand.vmem [shape: f32[1,1,96], index: 6, kind: input, shape index: {}]   ;;  %s3407_s7 = inlined_call_operand.vmem [shape: f32[2,1,32], index: 7, kind: input, shape index: {}]   ;;  %s3408_s8 = inlined_call_operand.vmem [shape: f32[32,4], index: 8, kind: input, shape index: {}]   ;;  %s3409_s9 = inlined_call_operand.hbm [shape: f32[1,4], index: 9, kind: input, shape index: {}]   ;;  %s3410_s10 = inlined_call_operand.hbm [shape: f32[2,4], index: 10, kind: output, shape index: {0}]   ;;  %s3411_s11 = inlined_call_operand.hbm [shape: f32[2,2,32], index: 11, kind: output, shape index: {1}, may-alias: {1,11}]  }
   0x1   :  { %18 = vsyncpa [#allocation7], 0 }
   0x2   :  { %19 = vsyncpa [#allocation10], 0 }
   0x3   :  { %20 = vsyncpa [#allocation5], 0 }
   0x4   :  { %21 = vsyncpa [#allocation13], 0  ;;  %s2838_s17 = smov [#allocation6]   ;;  %s2839_s19 = smov [#allocation3]  }
   0x5   :  { %s42_s18 = sshll.u32 %s2838_s17, 4  ;;  %s29_s20 = sshll.u32 %s2839_s19, 4  ;;  %s43_s18 = int_to_ptr.vmem [resolvable:$true] %s42_s18  ;;  %s2913_s20 = int_to_ptr.vmem [resolvable:$true] %s29_s20 }
   0x6   :  { %s2696_s23 = scalar_lea.hbm %s3402_s2, 64 }
   0x7   :  { %p2697_p0 = scmp.ne.s32.totalorder %s3402_s2, %s2696_s23  ;;  %p2700_p1 = scmp.lt.u32.totalorder %s2696_s23, %s3402_s2 }
   0x9   :  { %p2702_p2 = pnand %p2700_p1, %p2697_p0 }
   0xb   :  { %2705 = shalt.err (!%p2702_p2)
}
   0xc   :  { %s2706_s28 = scalar_lea.vmem %s43_s18, 64  ;;  %p2711_p4 = scmp.lt.s32.totalorder %s43_s18, %s43_s18 }
   0xd   :  { %p2707_p3 = scmp.ne.s32.totalorder %s43_s18, %s2706_s28  ;;  %p2712_p5 = scmp.lt.s32.totalorder %s2706_s28, %s2706_s28 }
   0xf   :  { %p2713_p6 = por %p2712_p5, %p2711_p4 }
  0x11   :  { %p2714_p7 = pnand %p2713_p6, %p2707_p3 }
  0x13   :  { %2717 = shalt.err (!%p2714_p7)
}
  0x14   :  { %45 = dma.hbm_to_vmem [thread:$0]  %s3402_s2, 64, %s43_s18, [#allocation7]  }
  0x15   :  { %s2718_s14 = scalar_lea.hbm %s3401_s1, 64 }
  0x16   :  { %p2719_p8 = scmp.ne.s32.totalorder %s3401_s1, %s2718_s14  ;;  %p2722_p9 = scmp.lt.u32.totalorder %s2718_s14, %s3401_s1 }
  0x18   :  { %p2724_p10 = pnand %p2722_p9, %p2719_p8 }
  0x1a   :  { %2727 = shalt.err (!%p2724_p10)
}
  0x1b   :  { %s2728_s21 = scalar_lea.vmem %s2913_s20, 64  ;;  %p2733_p12 = scmp.lt.s32.totalorder %s2913_s20, %s2913_s20 }
  0x1c   :  { %p2729_p11 = scmp.ne.s32.totalorder %s2913_s20, %s2728_s21  ;;  %p2734_p13 = scmp.lt.s32.totalorder %s2728_s21, %s2728_s21 }
  0x1e   :  { %p2735_p0 = por %p2734_p13, %p2733_p12 }
  0x20   :  { %p2736_p1 = pnand %p2735_p0, %p2729_p11 }
  0x22   :  { %2739 = shalt.err (!%p2736_p1)
}
  0x23   :  { %s2840_s2 = smov 32   ;;  %s2841_s18 = smov 2  }
  0x24   :  { %35 = dma.hbm_to_vmem [thread:$0]  %s3401_s1, 64, %s2913_s20, [#allocation4], %s2840_s2, %s2840_s2, %s2841_s18  }
  0x25   :  { %s2842_s24 = smov [#allocation8]   ;;  %s2740_s28 = scalar_lea.hbm %s3405_s5, 1024 }
  0x26   :  { %s55_s25 = sshll.u32 %s2842_s24, 4  ;;  %p2741_p2 = scmp.ne.s32.totalorder %s3405_s5, %s2740_s28  ;;  %s56_s25 = int_to_ptr.vmem [resolvable:$true] %s55_s25 }
  0x27   :  { %p2744_p3 = scmp.lt.u32.totalorder %s2740_s28, %s3405_s5 }
  0x29   :  { %p2746_p4 = pnand %p2744_p3, %p2741_p2 }
  0x2b   :  { %2749 = shalt.err (!%p2746_p4)
}
  0x2c   :  { %s2750_s14 = scalar_lea.vmem %s56_s25, 1024  ;;  %p2755_p6 = scmp.lt.s32.totalorder %s56_s25, %s56_s25 }
  0x2d   :  { %p2751_p5 = scmp.ne.s32.totalorder %s56_s25, %s2750_s14  ;;  %p2756_p7 = scmp.lt.s32.totalorder %s2750_s14, %s2750_s14 }
  0x2f   :  { %p2757_p8 = por %p2756_p7, %p2755_p6 }
  0x31   :  { %p2758_p9 = pnand %p2757_p8, %p2751_p5 }
  0x33   :  { %2761 = shalt.err (!%p2758_p9)
}
  0x34   :  { %s2843_s1 = smov 256   ;;  %s2844_s20 = smov 16  }
  0x35   :  { %61 = dma.hbm_to_vmem [thread:$0]  %s3405_s5, 1024, %s56_s25, [#allocation7], %s2843_s1, %s2843_s1, %s2844_s20  }
  0x36   :  { %s2845_s17 = smov [#allocation9]   ;;  %s2762_s23 = scalar_lea.hbm %s3409_s9, 16 }
  0x37   :  { %s74_s19 = sshll.u32 %s2845_s17, 4  ;;  %p2763_p10 = scmp.ne.s32.totalorder %s3409_s9, %s2762_s23  ;;  %s75_s19 = int_to_ptr.vmem [resolvable:$true] %s74_s19 }
  0x38   :  { %p2766_p11 = scmp.lt.u32.totalorder %s2762_s23, %s3409_s9 }
  0x3a   :  { %p2768_p12 = pnand %p2766_p11, %p2763_p10 }
  0x3c   :  { %2771 = shalt.err (!%p2768_p12)
}
  0x3d   :  { %s2772_s29 = scalar_lea.vmem %s75_s19, 16  ;;  %s2776_s5 = scalar_lea.vmem %s75_s19, 32 }
  0x3e   :  { %p2773_p13 = scmp.ne.s32.totalorder %s75_s19, %s2772_s29  ;;  %p2777_p0 = scmp.lt.s32.totalorder %s75_s19, %s75_s19 }
  0x3f   :  { %p2778_p1 = scmp.lt.s32.totalorder %s2776_s5, %s2772_s29 }
  0x41   :  { %p2779_p2 = por %p2778_p1, %p2777_p0 }
  0x43   :  { %p2780_p3 = pnand %p2779_p2, %p2773_p13 }
  0x45   :  { %2783 = shalt.err (!%p2780_p3)
}
  0x46   :  { %77 = dma.hbm_to_vmem [thread:$0]  %s3409_s9, 16, %s75_s19, [#allocation10]  }
  0x47   :  { %2828 = dma.done.wait [#allocation4], 64  }
  0x48   :  { %2829 = vsyncadd [#allocation4], 4294967232 }
  0x49   :  { %2830 = dma.done.wait [#allocation7], 1088  }
  0x4a   :  { %2831 = vsyncadd [#allocation7], 4294966208 }
  0x4b   :  { %2832 = dma.done.wait [#allocation10], 16  }
  0x4c   :  { %2833 = vsyncadd [#allocation10], 4294967280  ;;  %v2846_v0 = vmov 0.0|0.0   ;;  %vm3412_vm0 = vmmov 0   ;;  %v2848_v1 = vmov 0.0   ;;  %vm107_vm1 = vcmask 1043456  }
  0x4d   :  { %2461 = vmatprep.subr.bf16.mxu1 %v2846_v0  ;;  %2359 = vmatprep.mubr.msk.f32.mxu1 %vm3412_vm0, %v2848_v1  ;;  %vm100_vm2 = vcmask 31744   ;;  %v92_v2 = vld [vmem:[#allocation6] sm:$0xf]  ;;  %v91_v4 = vld [vmem:[%s3400_s0 + $0x8] sm:$0xff]  ;;  %v239_v7 = vld [vmem:[%s3404_s4 + $0x10] sm:$0xff]  ;;  %s2849_s24 = smov 64  }
  0x4e   :  { %v90_v3 = vld [vmem:[%s3400_s0] sm:$0xff]  ;;  %2346 = vmatprep.subr.msk.mxu0 %vm107_vm1, %v92_v2  ;;  %v238_v6 = vld [vmem:[%s3404_s4 + $0x8] sm:$0xff]  ;;  %v240_v9 = vld [vmem:[%s3404_s4 + $0x18] sm:$0xff]  ;;  %vm3414_vm3 = vcmask 261120   ;;  %vm235_vm4 = vcmask 778240   ;;  %vm189_vm5 = vcmask 1041409  }
  0x4f   :  { %2348 = vmatprep.mubr.msk.f32.mxu0 %vm100_vm2, %v90_v3  ;;  %v237_v5 = vld [vmem:[%s3404_s4] sm:$0xff]  ;;  %2347 = vmatpush3.msk.msra.mxu0 %vm107_vm1, %v92_v2  ;;  %v2465_v11 = vpack.c.bf16 %v240_v9, %v239_v7  ;;  %vm194_vm6 = vcmask 1042434   ;;  %vm198_vm7 = vcmask 780289   ;;  %vm200_vm8 = vcmask 1043459   ;;  %v249_v40 = vld [vmem:[#allocation8 + $0x8] sm:$0xff]  ;;  %v248_v42 = vld [vmem:[#allocation8] sm:$0xff] }
  0x50   :  { %v2462_v8 = vpack.c.bf16 %v238_v6, %v237_v5  ;;  %v2250_v10 = vld [vmem:[%s3407_s7] ss:$0 sm:$0xff]  ;;  %2349 = vmatmul.mubr.msk.f32.vlgmr.msra.gmra.mrb[0].mxu0 %vm100_vm2, %v91_v4  ;;  %vm204_vm9 = vcmask 781314   ;;  %vm233_vm10 = vcmask 785415   ;;  %vm206_vm11 = vcmask 1044484   ;;  %v250_v44 = vld [vmem:[#allocation8 + $0x10] sm:$0xff] }
  0x51   :  { %344 = vrot.lane.b32.xlu0 %v2250_v10, %s2849_s24  ;;  %439 = vmatprep.mubr.f32.mxu0 %v2848_v1  ;;  %v247_v12 = vld [vmem:[#allocation3] sm:$0x3]  ;;  %vm210_vm12 = vcmask 782339   ;;  %vm212_vm13 = vcmask 1045509   ;;  %vm218_vm14 = vcmask 1046534   ;;  %vm224_vm15 = vcmask 1047559  }
  0x52   :  { %2463 = vmatpush3.bf16.msra.mxu1 %v2462_v8  ;;  %v2246_v13 = vld [vmem:[%s3403_s3] ss:$0 sm:$0xff]  ;;  %vm192_vm1 = vcmask 779264   ;;  %vm216_vm2 = vcmask 783364   ;;  %vm222_vm0 = vcmask 784389   ;;  %v253_v45 = vld [vmem:[#allocation8 + $0x28] sm:$0xff]  ;;  %v3025_v47 = vpack.c.bf16 %v250_v44, %v248_v42 }
  0x53   :  { %2464 = vmatprep.subr.bf16.mxu1 %v2846_v0  ;;  %v251_v41 = vld [vmem:[#allocation8 + $0x18] sm:$0xff]  ;;  %v252_v49 = vld [vmem:[#allocation8 + $0x20] sm:$0xff]  ;;  %v254_v50 = vld [vmem:[#allocation8 + $0x30] sm:$0xff]  ;;  %s2850_s3 = smov 96  }
  0x54   :  { %v3023_v43 = vpack.c.bf16 %v251_v41, %v249_v40  ;;  %v255_v46 = vld [vmem:[#allocation8 + $0x38] sm:$0xff]  ;;  %v3032_v51 = vpack.c.bf16 %v254_v50, %v252_v49 }
  0x55   :  { %v3027_v48 = vpack.c.bf16 %v255_v46, %v253_v45 }
  0x56   :  { %2466 = vmatpush3.bf16.msra.mxu1 %v2465_v11  ;;  %2468 = vmatprep.subr.bf16.mxu0 %v3023_v43 }
  0x57   :  { %2476 = vmatprep.subr.bf16.mxu1 %v3023_v43  ;;  %2470 = vmatpush1.bf16.msra.mxu0 %v3025_v47 }
  0x58   :  { %2472 = vmatprep.subr.bf16.mxu0 %v3027_v48 }
  0x59   :  { %2360 = vmatmul.mubr.msk.f32.vlgmr.msra.gmra.mrb[0].mxu1 %vm3414_vm3, %v247_v12  ;;  %vm228_vm3 = vcmask 785414  }
  0x5a   :  { %558 = vmatprep.mubr.f32.mxu1 %v2848_v1  ;;  %2478 = vmatpush1.bf16.msra.mxu1 %v3025_v47 }
  0x5b   :  { %2480 = vmatprep.subr.bf16.mxu1 %v3027_v48  ;;  %2474 = vmatpush1.bf16.msra.mxu0 %v3032_v51 }
  0x5c   :  { %2484 = vmatprep.subr.bf16.mxu0 %v3023_v43 }
  0x5e   :  { %2482 = vmatpush1.bf16.msra.mxu1 %v3032_v51 }
  0x5f   :  { %2492 = vmatprep.subr.bf16.mxu1 %v3023_v43 }
  0xc3   :  { %v3013_v26 = vpop.permute.xlu0 %344 }
 0x123   :  { %v2350_v14 = vpop.f32.mrb[0].mxu0 }
 0x124   :  { %v183_v15 = vadd.f32 %v2350_v14, %v2246_v13  ;;  %v177_v16 = vpop.f32.mrb[1].mxu0 }
 0x125   :  { %v178_v17 = vadd.f32 %v2246_v13, %v177_v16 }
 0x126   :  { %v188_v18 = vrot.slane %v183_v15, 7 }
 0x127   :  { %234 = vst.msk [vmem:[#allocation2 + $0x7] sm:$0x80] %vm233_vm10, %v178_v17 }
 0x128   :  { %236 = vst.msk [vmem:[#allocation2 + $0xf] sm:$0x1] %vm235_vm4, %v188_v18  ;;  %v190_v19 = vsel %vm189_vm5, %v188_v18, %v178_v17  ;;  %v195_v20 = vsel %vm194_vm6, %v188_v18, %v178_v17  ;;  %v201_v21 = vsel %vm200_vm8, %v188_v18, %v178_v17  ;;  %v207_v22 = vsel %vm206_vm11, %v188_v18, %v178_v17 }
 0x129   :  { %199 = vst.msk [vmem:[#allocation2 + $0x1] sm:$0x6] %vm198_vm7, %v195_v20  ;;  %v213_v23 = vsel %vm212_vm13, %v188_v18, %v178_v17  ;;  %v219_v24 = vsel %vm218_vm14, %v188_v18, %v178_v17  ;;  %v225_v25 = vsel %vm224_vm15, %v188_v18, %v178_v17 }
 0x12a   :  { %205 = vst.msk [vmem:[#allocation2 + $0x2] sm:$0xc] %vm204_vm9, %v201_v21  ;;  %vm3422_vm9 = vmmov 0  }
 0x12b   :  { %211 = vst.msk [vmem:[#allocation2 + $0x3] sm:$0x18] %vm210_vm12, %v207_v22  ;;  %vm1274_vm12 = vcmask 254976  }
 0x12c   :  { %193 = vst.msk [vmem:[#allocation2] sm:$0x3] %vm192_vm1, %v190_v19  ;;  %v332_v27 = vpop.f32.mrb[0].mxu1 }
 0x12d   :  { %217 = vst.msk [vmem:[#allocation2 + $0x4] sm:$0x30] %vm216_vm2, %v213_v23  ;;  %v347_v28 = vadd.f32 %v3013_v26, %v332_v27  ;;  %v2361_v29 = vpop.f32.mrb[1].mxu1 }
 0x12e   :  { %223 = vst.msk [vmem:[#allocation2 + $0x5] sm:$0x60] %vm222_vm0, %v219_v24  ;;  %vm3415_vm0 = vcmask 261120  }
 0x12f   :  { %229 = vst.msk [vmem:[#allocation2 + $0x6] sm:$0xc0] %vm228_vm3, %v225_v25  ;;  %349 = vrot.lane.b32.xlu0 %v347_v28, %s2849_s24  ;;  %vm3416_vm3 = vmmov %vm3415_vm0 }
 0x130   :  { %v461_v63 = vld [vmem:[#allocation2 + $0x2] sm:$0x3]  ;;  %vm3417_vm4 = vmmov %vm3415_vm0 }
 0x131   :  { %v577_v21 = vld [vmem:[#allocation2 + $0x4] sm:$0x3]  ;;  %vm3418_vm5 = vmmov %vm3415_vm0 }
 0x132   :  { %v693_v42 = vld [vmem:[#allocation2 + $0x6] sm:$0x3]  ;;  %vm3419_vm6 = vmmov %vm3415_vm0 }
 0x133   :  { %365 = vrot.lane.b32.xlu0 %v247_v12, %s2840_s2  ;;  %v336_v30 = vld [vmem:[#allocation2] sm:$0x3]  ;;  %vm3420_vm7 = vmmov %vm3415_vm0 }
 0x134   :  { %v337_v31 = vadd.f32 %v336_v30, %v332_v27  ;;  %vm3421_vm8 = vmmov %vm3415_vm0 }
 0x135   :  { %vm3423_vm10 = vmmov %vm3415_vm0 }
 0x136   :  { %v2253_v32 = vmul.f32 -1.442695, %v337_v31  ;;  %vm3424_vm11 = vmmov %vm3415_vm0 }
 0x137   :  { %vm3425_vm13 = vmmov %vm3415_vm0 }
 0x138   :  { %2600 = vpow2.f32 %v2253_v32  ;;  %vm3426_vm14 = vmmov %vm3415_vm0 }
 0x139   :  { %vm3427_vm15 = vmmov %vm3415_vm0 }
 0x13a   :  { %vm3428_vm2 = vmmov %vm3415_vm0 }
 0x142   :  { %v2601_v33 = vpop.eup %2600 }
 0x143   :  { %v341_v34 = vadd.f32 1.0, %v2601_v33 }
 0x145   :  { %2602 = vrcp.f32 %v341_v34 }
 0x14f   :  { %v2603_v35 = vpop.eup %2602 }
 0x150   :  { %v359_v54 = vsub.f32 1.0, %v2603_v35 }
 0x1a1   :  { %v350_v36 = vpop.permute.xlu0 %349 }
 0x1a2   :  { %v352_v37 = vmul.f32 %v2603_v35, %v350_v36 }
 0x1a4   :  { %354 = vrot.lane.b32.xlu1 %v352_v37, %s2849_s24 }
 0x1a5   :  { %v366_v53 = vpop.permute.xlu0 %365 }
 0x1a6   :  { %v368_v56 = vmul.f32 %v2603_v35, %v366_v53 }
 0x216   :  { %v355_v38 = vpop.permute.xlu1 %354 }
 0x217   :  { %v357_v39 = vadd.f32 %v355_v38, %v336_v30 }
 0x219   :  { %2604 = vtanh.f32 %v357_v39 }
 0x223   :  { %v2605_v52 = vpop.eup %2604 }
 0x224   :  { %361 = vrot.lane.b32.xlu1 %v2605_v52, %s2850_s3 }
 0x296   :  { %v362_v55 = vpop.permute.xlu1 %361 }
 0x297   :  { %v364_v57 = vmul.f32 %v362_v55, %v359_v54 }
 0x299   :  { %v369_v58 = vadd.f32 %v368_v56, %v364_v57 }
 0x29b   :  { %371 = vrot.lane.b32.xlu1 %v369_v58, %s2850_s3 }
 0x30d   :  { %v372_v59 = vpop.permute.xlu1 %371 }
 0x30e   :  { %2254 = vmatmul.mubr.msk.f32.vlgmr.msra.gmra.mrb[2].mxu0 %vm3415_vm0, %v372_v59 }
 0x30f   :  { %2486 = vmatpush1.bf16.msra.mxu0 %v3025_v47  ;;  %674 = vmatprep.mubr.f32.mxu0 %v2848_v1 }
 0x310   :  { %2488 = vmatprep.subr.bf16.mxu0 %v3027_v48 }
 0x313   :  { %2490 = vmatpush1.bf16.msra.mxu0 %v3032_v51 }
 0x314   :  { %2500 = vmatprep.subr.bf16.mxu0 %v3023_v43 }
 0x3e1   :  { %v3049_v60 = vpop.f32.mrb[2].mxu0 }
 0x3e2   :  { %v469_v61 = vadd.f32 %v3049_v60, %v3013_v26  ;;  %v3053_v62 = vpop.f32.mrb[3].mxu0  ;;  %v462_v2 = vadd.f32 %v461_v63, %v3049_v60 }
 0x3e4   :  { %471 = vrot.lane.b32.xlu0 %v469_v61, %s2849_s24  ;;  %v2255_v3 = vmul.f32 -1.442695, %v462_v2 }
 0x3e6   :  { %2606 = vpow2.f32 %v2255_v3 }
 0x3f0   :  { %v2607_v4 = vpop.eup %2606 }
 0x3f1   :  { %v466_v5 = vadd.f32 1.0, %v2607_v4 }
 0x3f3   :  { %2608 = vrcp.f32 %v466_v5 }
 0x3fd   :  { %v2609_v6 = vpop.eup %2608 }
 0x3fe   :  { %v481_v12 = vsub.f32 1.0, %v2609_v6  ;;  %v487_v14 = vmul.f32 %v2609_v6, %v369_v58 }
 0x456   :  { %v472_v7 = vpop.permute.xlu0 %471 }
 0x457   :  { %v474_v8 = vmul.f32 %v2609_v6, %v472_v7  ;;  %v809_v6 = vld [vmem:[#allocation2 + $0x8] sm:$0x3] }
 0x459   :  { %476 = vrot.lane.b32.xlu1 %v474_v8, %s2849_s24 }
 0x4cb   :  { %v477_v9 = vpop.permute.xlu1 %476 }
 0x4cc   :  { %v479_v10 = vadd.f32 %v477_v9, %v461_v63 }
 0x4ce   :  { %2610 = vtanh.f32 %v479_v10 }
 0x4d8   :  { %v2611_v11 = vpop.eup %2610 }
 0x4d9   :  { %483 = vrot.lane.b32.xlu0 %v2611_v11, %s2850_s3 }
 0x54b   :  { %v484_v13 = vpop.permute.xlu0 %483 }
 0x54c   :  { %v486_v15 = vmul.f32 %v484_v13, %v481_v12 }
 0x54e   :  { %v488_v16 = vadd.f32 %v487_v14, %v486_v15 }
 0x550   :  { %490 = vrot.lane.b32.xlu1 %v488_v16, %s2850_s3 }
 0x5c2   :  { %v491_v17 = vpop.permute.xlu1 %490 }
 0x5c3   :  { %2256 = vmatmul.mubr.msk.f32.vlgmr.msra.gmra.mrb[2].mxu1 %vm3416_vm3, %v491_v17  ;;  %vm3429_vm3 = vmmov %vm3415_vm0 }
 0x5c4   :  { %2494 = vmatpush1.bf16.msra.mxu1 %v3025_v47  ;;  %790 = vmatprep.mubr.f32.mxu1 %v2848_v1 }
 0x5c5   :  { %2496 = vmatprep.subr.bf16.mxu1 %v3027_v48 }
 0x5c8   :  { %2498 = vmatpush1.bf16.msra.mxu1 %v3032_v51 }
 0x5c9   :  { %2508 = vmatprep.subr.bf16.mxu1 %v3023_v43 }
 0x696   :  { %v3066_v18 = vpop.f32.mrb[2].mxu1 }
 0x697   :  { %v585_v19 = vadd.f32 %v3066_v18, %v3013_v26  ;;  %v3070_v20 = vpop.f32.mrb[3].mxu1  ;;  %v578_v22 = vadd.f32 %v577_v21, %v3066_v18 }
 0x699   :  { %587 = vrot.lane.b32.xlu0 %v585_v19, %s2849_s24  ;;  %v2257_v23 = vmul.f32 -1.442695, %v578_v22 }
 0x69b   :  { %2612 = vpow2.f32 %v2257_v23 }
 0x6a5   :  { %v2613_v24 = vpop.eup %2612 }
 0x6a6   :  { %v582_v25 = vadd.f32 1.0, %v2613_v24 }
 0x6a8   :  { %2614 = vrcp.f32 %v582_v25 }
 0x6b2   :  { %v2615_v27 = vpop.eup %2614 }
 0x6b3   :  { %v597_v33 = vsub.f32 1.0, %v2615_v27  ;;  %v603_v35 = vmul.f32 %v2615_v27, %v488_v16 }
 0x70b   :  { %v588_v28 = vpop.permute.xlu0 %587 }
 0x70c   :  { %v590_v29 = vmul.f32 %v2615_v27, %v588_v28  ;;  %v925_v28 = vld [vmem:[#allocation2 + $0xa] sm:$0x3] }
 0x70e   :  { %592 = vrot.lane.b32.xlu1 %v590_v29, %s2849_s24 }
 0x780   :  { %v593_v30 = vpop.permute.xlu1 %592 }
 0x781   :  { %v595_v31 = vadd.f32 %v593_v30, %v577_v21 }
 0x783   :  { %2616 = vtanh.f32 %v595_v31 }
 0x78d   :  { %v2617_v32 = vpop.eup %2616 }
 0x78e   :  { %599 = vrot.lane.b32.xlu0 %v2617_v32, %s2850_s3 }
 0x800   :  { %v600_v34 = vpop.permute.xlu0 %599 }
 0x801   :  { %v602_v36 = vmul.f32 %v600_v34, %v597_v33 }
 0x803   :  { %v604_v37 = vadd.f32 %v603_v35, %v602_v36 }
 0x805   :  { %606 = vrot.lane.b32.xlu1 %v604_v37, %s2850_s3 }
 0x877   :  { %v607_v38 = vpop.permute.xlu1 %606 }
 0x878   :  { %2258 = vmatmul.mubr.msk.f32.vlgmr.msra.gmra.mrb[4].mxu0 %vm3417_vm4, %v607_v38  ;;  %vm3430_vm4 = vmmov %vm3415_vm0 }
 0x879   :  { %2502 = vmatpush1.bf16.msra.mxu0 %v3025_v47  ;;  %906 = vmatprep.mubr.f32.mxu0 %v2848_v1 }
 0x87a   :  { %2504 = vmatprep.subr.bf16.mxu0 %v3027_v48 }
 0x87d   :  { %2506 = vmatpush1.bf16.msra.mxu0 %v3032_v51 }
 0x87e   :  { %2516 = vmatprep.subr.bf16.mxu0 %v3023_v43 }
 0x94b   :  { %v3083_v39 = vpop.f32.mrb[4].mxu0 }
 0x94c   :  { %v701_v40 = vadd.f32 %v3083_v39, %v3013_v26  ;;  %v3087_v41 = vpop.f32.mrb[5].mxu0  ;;  %v694_v44 = vadd.f32 %v693_v42, %v3083_v39 }
 0x94e   :  { %703 = vrot.lane.b32.xlu0 %v701_v40, %s2849_s24  ;;  %v2259_v45 = vmul.f32 -1.442695, %v694_v44 }
 0x950   :  { %2618 = vpow2.f32 %v2259_v45 }
 0x95a   :  { %v2619_v46 = vpop.eup %2618 }
 0x95b   :  { %v698_v49 = vadd.f32 1.0, %v2619_v46 }
 0x95d   :  { %2620 = vrcp.f32 %v698_v49 }
 0x967   :  { %v2621_v50 = vpop.eup %2620 }
 0x968   :  { %v713_v57 = vsub.f32 1.0, %v2621_v50  ;;  %v719_v59 = vmul.f32 %v2621_v50, %v604_v37 }
 0x9c0   :  { %v704_v52 = vpop.permute.xlu0 %703 }
 0x9c1   :  { %v706_v53 = vmul.f32 %v2621_v50, %v704_v52 }
 0x9c3   :  { %708 = vrot.lane.b32.xlu1 %v706_v53, %s2849_s24 }
 0xa35   :  { %v709_v54 = vpop.permute.xlu1 %708 }
 0xa36   :  { %v711_v55 = vadd.f32 %v709_v54, %v693_v42  ;;  %v1041_v54 = vld [vmem:[#allocation2 + $0xc] sm:$0x3] }
 0xa38   :  { %2622 = vtanh.f32 %v711_v55 }
 0xa42   :  { %v2623_v56 = vpop.eup %2622 }
 0xa43   :  { %715 = vrot.lane.b32.xlu0 %v2623_v56, %s2850_s3 }
 0xab5   :  { %v716_v58 = vpop.permute.xlu0 %715 }
 0xab6   :  { %v718_v61 = vmul.f32 %v716_v58, %v713_v57 }
 0xab8   :  { %v720_v63 = vadd.f32 %v719_v59, %v718_v61 }
 0xaba   :  { %722 = vrot.lane.b32.xlu1 %v720_v63, %s2850_s3 }
 0xb2c   :  { %v723_v2 = vpop.permute.xlu1 %722 }
 0xb2d   :  { %2260 = vmatmul.mubr.msk.f32.vlgmr.msra.gmra.mrb[4].mxu1 %vm3418_vm5, %v723_v2  ;;  %v2251_v2 = vld [vmem:[%s3406_s6] ss:$0 sm:$0xff]  ;;  %vm3431_vm5 = vmmov %vm3415_vm0 }
 0xb2e   :  { %2510 = vmatpush1.bf16.msra.mxu1 %v3025_v47  ;;  %1022 = vmatprep.mubr.f32.mxu1 %v2848_v1 }
 0xb2f   :  { %2512 = vmatprep.subr.bf16.mxu1 %v3027_v48 }
 0xb32   :  { %2514 = vmatpush1.bf16.msra.mxu1 %v3032_v51 }
 0xb33   :  { %2524 = vmatprep.subr.bf16.mxu1 %v3023_v43 }
 0xc00   :  { %v3100_v3 = vpop.f32.mrb[4].mxu1 }
 0xc01   :  { %v817_v4 = vadd.f32 %v3100_v3, %v3013_v26  ;;  %v3104_v5 = vpop.f32.mrb[5].mxu1  ;;  %v810_v7 = vadd.f32 %v809_v6, %v3100_v3 }
 0xc03   :  { %819 = vrot.lane.b32.xlu0 %v817_v4, %s2849_s24  ;;  %v2261_v8 = vmul.f32 -1.442695, %v810_v7 }
 0xc05   :  { %2624 = vpow2.f32 %v2261_v8 }
 0xc0f   :  { %v2625_v9 = vpop.eup %2624 }
 0xc10   :  { %v814_v10 = vadd.f32 1.0, %v2625_v9 }
 0xc12   :  { %2626 = vrcp.f32 %v814_v10 }
 0xc1c   :  { %v2627_v11 = vpop.eup %2626 }
 0xc1d   :  { %v829_v16 = vsub.f32 1.0, %v2627_v11  ;;  %v835_v19 = vmul.f32 %v2627_v11, %v720_v63 }
 0xc75   :  { %v820_v12 = vpop.permute.xlu0 %819 }
 0xc76   :  { %v822_v43 = vmul.f32 %v2627_v11, %v820_v12  ;;  %v2274_v12 = vld [vmem:[%s3407_s7 + $0x1] ss:$0 sm:$0xff] }
 0xc78   :  { %824 = vrot.lane.b32.xlu1 %v822_v43, %s2849_s24 }
 0xcea   :  { %v825_v13 = vpop.permute.xlu1 %824 }
 0xceb   :  { %v827_v14 = vadd.f32 %v825_v13, %v809_v6  ;;  %v2269_v13 = vld [vmem:[%s3404_s4 + $0x20] sm:$0xff] }
 0xced   :  { %2628 = vtanh.f32 %v827_v14 }
 0xcf7   :  { %v2629_v15 = vpop.eup %2628 }
 0xcf8   :  { %831 = vrot.lane.b32.xlu0 %v2629_v15, %s2850_s3  ;;  %v2271_v15 = vld [vmem:[%s3404_s4 + $0x30] sm:$0xff] }
 0xd6a   :  { %v832_v17 = vpop.permute.xlu0 %831 }
 0xd6b   :  { %v834_v21 = vmul.f32 %v832_v17, %v829_v16 }
 0xd6d   :  { %v836_v22 = vadd.f32 %v835_v19, %v834_v21  ;;  %v1289_v21 = vld [vmem:[#allocation3 + $0x2] sm:$0x3] }
 0xd6f   :  { %838 = vrot.lane.b32.xlu1 %v836_v22, %s2850_s3 }
 0xde1   :  { %v839_v23 = vpop.permute.xlu1 %838 }
 0xde2   :  { %2262 = vmatmul.mubr.msk.f32.vlgmr.msra.gmra.mrb[6].mxu0 %vm3419_vm6, %v839_v23  ;;  %vm3432_vm6 = vmmov %vm3415_vm0 }
 0xde3   :  { %2518 = vmatpush1.bf16.msra.mxu0 %v3025_v47  ;;  %1138 = vmatprep.mubr.f32.mxu0 %v2848_v1 }
 0xde4   :  { %2520 = vmatprep.subr.bf16.mxu0 %v3027_v48 }
 0xde7   :  { %2522 = vmatpush1.bf16.msra.mxu0 %v3032_v51 }
 0xde8   :  { %2531 = vmatprep.subr.bf16.mxu0 %v2846_v0 }
 0xeb5   :  { %v3117_v24 = vpop.f32.mrb[6].mxu0 }
 0xeb6   :  { %v933_v25 = vadd.f32 %v3117_v24, %v3013_v26  ;;  %v3121_v27 = vpop.f32.mrb[7].mxu0  ;;  %v926_v29 = vadd.f32 %v925_v28, %v3117_v24 }
 0xeb8   :  { %935 = vrot.lane.b32.xlu0 %v933_v25, %s2849_s24  ;;  %v2263_v30 = vmul.f32 -1.442695, %v926_v29 }
 0xeba   :  { %2630 = vpow2.f32 %v2263_v30 }
 0xec4   :  { %v2631_v31 = vpop.eup %2630 }
 0xec5   :  { %v930_v32 = vadd.f32 1.0, %v2631_v31 }
 0xec7   :  { %2632 = vrcp.f32 %v930_v32 }
 0xed1   :  { %v2633_v33 = vpop.eup %2632 }
 0xed2   :  { %v945_v40 = vsub.f32 1.0, %v2633_v33  ;;  %v951_v44 = vmul.f32 %v2633_v33, %v836_v22 }
 0xf2a   :  { %v936_v34 = vpop.permute.xlu0 %935 }
 0xf2b   :  { %v938_v35 = vmul.f32 %v2633_v33, %v936_v34  ;;  %v1157_v34 = vld [vmem:[#allocation2 + $0xe] sm:$0x3] }
 0xf2d   :  { %940 = vrot.lane.b32.xlu1 %v938_v35, %s2849_s24 }
 0xf9f   :  { %v941_v36 = vpop.permute.xlu1 %940 }
 0xfa0   :  { %v943_v37 = vadd.f32 %v941_v36, %v925_v28 }
 0xfa2   :  { %2634 = vtanh.f32 %v943_v37 }
 0xfac   :  { %v2635_v38 = vpop.eup %2634 }
 0xfad   :  { %947 = vrot.lane.b32.xlu0 %v2635_v38, %s2850_s3 }
0x101f   :  { %v948_v42 = vpop.permute.xlu0 %947 }
0x1020   :  { %v950_v45 = vmul.f32 %v948_v42, %v945_v40 }
0x1022   :  { %v952_v46 = vadd.f32 %v951_v44, %v950_v45 }
0x1024   :  { %954 = vrot.lane.b32.xlu1 %v952_v46, %s2850_s3 }
0x1096   :  { %v955_v49 = vpop.permute.xlu1 %954 }
0x1097   :  { %2264 = vmatmul.mubr.msk.f32.vlgmr.msra.gmra.mrb[6].mxu1 %vm3420_vm7, %v955_v49  ;;  %vm3433_vm7 = vmmov %vm3415_vm0 }
0x1098   :  { %2526 = vmatpush1.bf16.msra.mxu1 %v3025_v47  ;;  %1254 = vmatprep.mubr.f32.mxu1 %v2848_v1 }
0x1099   :  { %2528 = vmatprep.subr.bf16.mxu1 %v3027_v48 }
0x109c   :  { %2530 = vmatpush1.bf16.msra.mxu1 %v3032_v51 }
0x109d   :  { %2537 = vmatprep.subr.bf16.mxu1 %v2846_v0 }
0x116a   :  { %v3134_v50 = vpop.f32.mrb[6].mxu1 }
0x116b   :  { %v1049_v52 = vadd.f32 %v3134_v50, %v3013_v26  ;;  %v3138_v53 = vpop.f32.mrb[7].mxu1  ;;  %v1042_v47 = vadd.f32 %v1041_v54, %v3134_v50 }
0x116d   :  { %1051 = vrot.lane.b32.xlu0 %v1049_v52, %s2849_s24  ;;  %v2265_v55 = vmul.f32 -1.442695, %v1042_v47 }
0x116f   :  { %2636 = vpow2.f32 %v2265_v55 }
0x1179   :  { %v2637_v56 = vpop.eup %2636 }
0x117a   :  { %v1046_v48 = vadd.f32 1.0, %v2637_v56 }
0x117c   :  { %2638 = vrcp.f32 %v1046_v48 }
0x1186   :  { %v2639_v51 = vpop.eup %2638 }
0x1187   :  { %v1061_v4 = vsub.f32 1.0, %v2639_v51  ;;  %v1067_v7 = vmul.f32 %v2639_v51, %v952_v46 }
0x11df   :  { %v1052_v57 = vpop.permute.xlu0 %1051 }
0x11e0   :  { %v1054_v58 = vmul.f32 %v2639_v51, %v1052_v57 }
0x11e2   :  { %1056 = vrot.lane.b32.xlu1 %v1054_v58, %s2849_s24 }
0x1254   :  { %v1057_v59 = vpop.permute.xlu1 %1056 }
0x1255   :  { %v1059_v61 = vadd.f32 %v1057_v59, %v1041_v54 }
0x1257   :  { %2640 = vtanh.f32 %v1059_v61 }
0x1261   :  { %v2641_v63 = vpop.eup %2640 }
0x1262   :  { %1063 = vrot.lane.b32.xlu0 %v2641_v63, %s2850_s3 }
0x1266   :  { %446 = vrot.lane.b32.xlu0 %v2251_v2, %s2850_s3 }
0x12d4   :  { %v1064_v6 = vpop.permute.xlu0 %1063 }
0x12d5   :  { %v1066_v8 = vmul.f32 %v1064_v6, %v1061_v4 }
0x12d7   :  { %v3148_v9 = vadd.f32 %v1067_v7, %v1066_v8 }
0x12d8   :  { %v3150_v10 = vpop.permute.xlu0 %446 }
0x12d9   :  { %1070 = vrot.lane.b32.xlu1 %v3148_v9, %s2850_s3  ;;  %v449_v11 = vadd.f32 %v3150_v10, %v3049_v60  ;;  %v450_v43 = vadd.f32 %v3150_v10, %v3053_v62  ;;  %v2270_v60 = vld [vmem:[%s3404_s4 + $0x28] sm:$0xff]  ;;  %v2272_v62 = vld [vmem:[%s3404_s4 + $0x38] sm:$0xff] }
0x12da   :  { %v3170_v14 = vpack.c.bf16 %v2270_v60, %v2269_v13  ;;  %v3180_v17 = vpack.c.bf16 %v2272_v62, %v2271_v15 }
0x12db   :  { %453 = vrot.lane.b32.xlu0 %v449_v11, %s2840_s2  ;;  %v565_v11 = vadd.f32 %v3066_v18, %v3150_v10 }
0x12dd   :  { %1371 = vrot.lane.b32.xlu1 %v2274_v12, %s2849_s24 }
0x12e1   :  { %455 = vrot.lane.b32.xlu1 %v450_v43, %s2840_s2 }
0x134b   :  { %v1071_v16 = vpop.permute.xlu1 %1070 }
0x134c   :  { %2266 = vmatmul.mubr.msk.f32.vlgmr.msra.gmra.mrb[8].mxu0 %vm3421_vm8, %v1071_v16  ;;  %vm3434_vm8 = vmmov %vm3415_vm0 }
0x134d   :  { %2533 = vmatpush3.bf16.msra.mxu0 %v3170_v14  ;;  %2370 = vmatprep.mubr.msk.f32.mxu0 %vm3422_vm9, %v2848_v1  ;;  %v454_v22 = vpop.permute.xlu0 %453 }
0x134e   :  { %2534 = vmatprep.subr.bf16.mxu0 %v2846_v0 }
0x134f   :  { %v3185_v19 = vpop.permute.xlu1 %1371 }
0x1351   :  { %2536 = vmatpush3.bf16.msra.mxu0 %v3180_v17 }
0x1352   :  { %2543 = vmatprep.subr.bf16.mxu0 %v2846_v0 }
0x1353   :  { %v456_v23 = vpop.permute.xlu1 %455 }
0x1354   :  { %2371 = vmatmul.mubr.msk.f32.vlgmr.msra.gmra.mrb[10].mxu0 %vm3423_vm10, %v1289_v21  ;;  %v457_v25 = vsel %vm3424_vm11, %v454_v22, %v456_v23  ;;  %vm3435_vm10 = vmmov %vm3415_vm0 }
0x1355   :  { %460 = vst.msk [vmem:[#allocation2 + $0x10] sm:$0x3] %vm192_vm1, %v457_v25  ;;  %2545 = vmatpush3.bf16.msra.mxu0 %v3170_v14  ;;  %2392 = vmatprep.mubr.msk.f32.mxu0 %vm3422_vm9, %v2848_v1  ;;  %vm3436_vm11 = vmmov %vm3415_vm0 }
0x1356   :  { %2546 = vmatprep.subr.bf16.mxu0 %v2846_v0 }
0x1359   :  { %2548 = vmatpush3.bf16.msra.mxu0 %v3180_v17 }
0x135a   :  { %2555 = vmatprep.subr.bf16.mxu0 %v2846_v0 }
0x135c   :  { %v1290_v37 = vld [vmem:[#allocation2 + $0x10] sm:$0x3] }
0x141f   :  { %v3198_v28 = vpop.f32.mrb[8].mxu0 }
0x1420   :  { %v1165_v29 = vadd.f32 %v3198_v28, %v3013_v26  ;;  %v3202_v30 = vpop.f32.mrb[9].mxu0  ;;  %v1158_v35 = vadd.f32 %v1157_v34, %v3198_v28 }
0x1422   :  { %1167 = vrot.lane.b32.xlu0 %v1165_v29, %s2849_s24  ;;  %v2267_v36 = vmul.f32 -1.442695, %v1158_v35 }
0x1424   :  { %2642 = vpow2.f32 %v2267_v36 }
0x1427   :  { %v1360_v31 = vpop.f32.mrb[10].mxu0 }
0x1428   :  { %v1374_v32 = vadd.f32 %v3185_v19, %v1360_v31  ;;  %v2372_v33 = vpop.f32.mrb[11].mxu0  ;;  %v1364_v38 = vadd.f32 %v1360_v31, %v1290_v37 }
0x142a   :  { %1376 = vrot.lane.b32.xlu1 %v1374_v32, %s2849_s24  ;;  %v2276_v40 = vmul.f32 -1.442695, %v1364_v38 }
0x142c   :  { %2644 = vpow2.f32 %v2276_v40 }
0x142e   :  { %v2643_v26 = vpop.eup %2642 }
0x142f   :  { %v1162_v42 = vadd.f32 1.0, %v2643_v26 }
0x1431   :  { %2646 = vrcp.f32 %v1162_v42 }
0x1436   :  { %v2645_v44 = vpop.eup %2644 }
0x1437   :  { %v1368_v45 = vadd.f32 1.0, %v2645_v44  ;;  %v681_v44 = vadd.f32 %v3083_v39, %v3150_v10 }
0x1439   :  { %2648 = vrcp.f32 %v1368_v45 }
0x143b   :  { %v2647_v46 = vpop.eup %2646 }
0x143c   :  { %v1177_v61 = vsub.f32 1.0, %v2647_v46  ;;  %v1183_v2 = vmul.f32 %v2647_v46, %v3148_v9  ;;  %v566_v9 = vadd.f32 %v3070_v20, %v3150_v10 }
0x1443   :  { %v2649_v54 = vpop.eup %2648 }
0x1444   :  { %v1386_v8 = vsub.f32 1.0, %v2649_v54 }
0x1494   :  { %v1168_v49 = vpop.permute.xlu0 %1167 }
0x1495   :  { %v1170_v52 = vmul.f32 %v2647_v46, %v1168_v49 }
0x1497   :  { %1172 = vrot.lane.b32.xlu0 %v1170_v52, %s2849_s24 }
0x149c   :  { %v1377_v47 = vpop.permute.xlu1 %1376 }
0x149d   :  { %v1379_v55 = vmul.f32 %v2649_v54, %v1377_v47  ;;  %v682_v47 = vadd.f32 %v3087_v41, %v3150_v10 }
0x149f   :  { %1381 = vrot.lane.b32.xlu1 %v1379_v55, %s2849_s24 }
0x1509   :  { %v1173_v56 = vpop.permute.xlu0 %1172 }
0x150a   :  { %v1175_v48 = vadd.f32 %v1173_v56, %v1157_v34 }
0x150c   :  { %2650 = vtanh.f32 %v1175_v48 }
0x1511   :  { %v1382_v51 = vpop.permute.xlu1 %1381 }
0x1512   :  { %v1384_v57 = vadd.f32 %v1382_v51, %v1290_v37 }
0x1514   :  { %2652 = vtanh.f32 %v1384_v57 }
0x1516   :  { %v2651_v58 = vpop.eup %2650 }
0x1517   :  { %1179 = vrot.lane.b32.xlu0 %v2651_v58, %s2850_s3 }
0x151b   :  { %1392 = vrot.lane.b32.xlu0 %v1289_v21, %s2840_s2 }
0x151e   :  { %v2653_v59 = vpop.eup %2652 }
0x151f   :  { %1388 = vrot.lane.b32.xlu1 %v2653_v59, %s2850_s3 }
0x1589   :  { %v1180_v63 = vpop.permute.xlu0 %1179 }
0x158a   :  { %v1182_v4 = vmul.f32 %v1180_v63, %v1177_v61 }
0x158c   :  { %v1184_v6 = vadd.f32 %v1183_v2, %v1182_v4 }
0x158d   :  { %v1393_v7 = vpop.permute.xlu0 %1392 }
0x158e   :  { %1186 = vrot.lane.b32.xlu1 %v1184_v6, %s2850_s3  ;;  %v1395_v43 = vmul.f32 %v2649_v54, %v1393_v7 }
0x1591   :  { %v1389_v12 = vpop.permute.xlu1 %1388 }
0x1592   :  { %v1391_v13 = vmul.f32 %v1389_v12, %v1386_v8  ;;  %569 = vrot.lane.b32.xlu1 %v565_v11, %s2840_s2 }
0x1594   :  { %v1396_v60 = vadd.f32 %v1395_v43, %v1391_v13  ;;  %v797_v43 = vadd.f32 %v3100_v3, %v3150_v10 }
0x1596   :  { %1399 = vrot.lane.b32.xlu0 %v1396_v60, %s2850_s3 }
0x159a   :  { %571 = vrot.lane.b32.xlu0 %v566_v9, %s2840_s2 }
0x1600   :  { %v1187_v15 = vpop.permute.xlu1 %1186 }
0x1601   :  { %1275 = vst.msk [vmem:[#allocation12] sm:$0x3] %vm1274_vm12, %v1187_v15  ;;  %2268 = vmatmul.mubr.msk.f32.vlgmr.msra.gmra.mrb[8].mxu1 %vm3425_vm13, %v1187_v15  ;;  %vm3438_vm13 = vmmov %vm3415_vm0 }
0x1602   :  { %2539 = vmatpush3.bf16.msra.mxu1 %v3170_v14  ;;  %2381 = vmatprep.mubr.msk.f32.mxu1 %vm3422_vm9, %v2848_v1 }
0x1603   :  { %2540 = vmatprep.subr.bf16.mxu1 %v2846_v0 }
0x1604   :  { %v570_v20 = vpop.permute.xlu1 %569 }
0x1606   :  { %2542 = vmatpush3.bf16.msra.mxu1 %v3180_v17 }
0x1607   :  { %2549 = vmatprep.subr.bf16.mxu1 %v2846_v0 }
0x1608   :  { %v1400_v18 = vpop.permute.xlu0 %1399 }
0x1609   :  { %2382 = vmatmul.mubr.msk.f32.vlgmr.msra.gmra.mrb[10].mxu1 %vm3426_vm14, %v1400_v18 }
0x160a   :  { %2551 = vmatpush3.bf16.msra.mxu1 %v3170_v14  ;;  %2403 = vmatprep.mubr.msk.f32.mxu1 %vm3422_vm9, %v2848_v1 }
0x160b   :  { %2552 = vmatprep.subr.bf16.mxu1 %v2846_v0 }
0x160c   :  { %v572_v62 = vpop.permute.xlu0 %571 }
0x160d   :  { %v573_v16 = vsel %vm3427_vm15, %v570_v20, %v572_v62  ;;  %v798_v20 = vadd.f32 %v3104_v5, %v3150_v10 }
0x160e   :  { %576 = vst.msk [vmem:[#allocation2 + $0x12] sm:$0x3] %vm192_vm1, %v573_v16  ;;  %2554 = vmatpush3.bf16.msra.mxu1 %v3180_v17 }
0x160f   :  { %2561 = vmatprep.subr.bf16.mxu1 %v2846_v0 }
0x1615   :  { %v1397_v31 = vld [vmem:[#allocation2 + $0x12] sm:$0x3] }
0x16d4   :  { %v3239_v21 = vpop.f32.mrb[8].mxu1 }
0x16d5   :  { %v3241_v22 = vpop.f32.mrb[9].mxu1 }
0x16dc   :  { %v1469_v23 = vpop.f32.mrb[10].mxu1 }
0x16dd   :  { %v1480_v25 = vadd.f32 %v1469_v23, %v3185_v19  ;;  %v2383_v29 = vpop.f32.mrb[11].mxu1  ;;  %v1473_v32 = vadd.f32 %v1469_v23, %v1397_v31 }
0x16df   :  { %1482 = vrot.lane.b32.xlu1 %v1480_v25, %s2849_s24  ;;  %v2278_v33 = vmul.f32 -1.442695, %v1473_v32 }
0x16e1   :  { %2654 = vpow2.f32 %v2278_v33 }
0x16eb   :  { %v2655_v34 = vpop.eup %2654 }
0x16ec   :  { %v1477_v35 = vadd.f32 1.0, %v2655_v34 }
0x16ee   :  { %2656 = vrcp.f32 %v1477_v35 }
0x16f8   :  { %v2657_v36 = vpop.eup %2656 }
0x16f9   :  { %v1492_v45 = vsub.f32 1.0, %v2657_v36  ;;  %v1498_v49 = vmul.f32 %v2657_v36, %v1396_v60 }
0x1751   :  { %v1483_v37 = vpop.permute.xlu1 %1482 }
0x1752   :  { %v1485_v38 = vmul.f32 %v2657_v36, %v1483_v37 }
0x1754   :  { %1487 = vrot.lane.b32.xlu0 %v1485_v38, %s2849_s24 }
0x17c6   :  { %v1488_v40 = vpop.permute.xlu0 %1487 }
0x17c7   :  { %v1490_v26 = vadd.f32 %v1488_v40, %v1397_v31 }
0x17c9   :  { %2658 = vtanh.f32 %v1490_v26 }
0x17d3   :  { %v2659_v42 = vpop.eup %2658 }
0x17d4   :  { %1494 = vrot.lane.b32.xlu1 %v2659_v42, %s2850_s3 }
0x17d8   :  { %685 = vrot.lane.b32.xlu1 %v681_v44, %s2840_s2  ;;  %v913_v44 = vadd.f32 %v3117_v24, %v3150_v10 }
0x1846   :  { %v1495_v46 = vpop.permute.xlu1 %1494 }
0x1847   :  { %v1497_v52 = vmul.f32 %v1495_v46, %v1492_v45 }
0x1849   :  { %v1499_v54 = vadd.f32 %v1498_v49, %v1497_v52 }
0x184a   :  { %v686_v39 = vpop.permute.xlu1 %685 }
0x184b   :  { %1502 = vrot.lane.b32.xlu0 %v1499_v54, %s2850_s3 }
0x184f   :  { %687 = vrot.lane.b32.xlu0 %v682_v47, %s2840_s2  ;;  %v914_v47 = vadd.f32 %v3121_v27, %v3150_v10 }
0x18bd   :  { %v1503_v55 = vpop.permute.xlu0 %1502 }
0x18be   :  { %2393 = vmatmul.mubr.msk.f32.vlgmr.msra.gmra.mrb[12].mxu0 %vm3428_vm2, %v1503_v55 }
0x18bf   :  { %2557 = vmatpush3.bf16.msra.mxu0 %v3170_v14  ;;  %2414 = vmatprep.mubr.msk.f32.mxu0 %vm3422_vm9, %v2848_v1 }
0x18c0   :  { %2558 = vmatprep.subr.bf16.mxu0 %v2846_v0 }
0x18c1   :  { %v688_v56 = vpop.permute.xlu0 %687 }
0x18c2   :  { %v689_v48 = vsel %vm3415_vm0, %v686_v39, %v688_v56 }
0x18c3   :  { %692 = vst.msk [vmem:[#allocation2 + $0x14] sm:$0x3] %vm192_vm1, %v689_v48  ;;  %2560 = vmatpush3.bf16.msra.mxu0 %v3180_v17 }
0x18c4   :  { %2567 = vmatprep.subr.bf16.mxu0 %v2846_v0 }
0x18ca   :  { %v1500_v58 = vld [vmem:[#allocation2 + $0x14] sm:$0x3] }
0x1991   :  { %v1572_v41 = vpop.f32.mrb[12].mxu0 }
0x1992   :  { %v1583_v51 = vadd.f32 %v1572_v41, %v3185_v19  ;;  %v2394_v57 = vpop.f32.mrb[13].mxu0  ;;  %v1576_v59 = vadd.f32 %v1572_v41, %v1500_v58 }
0x1994   :  { %1585 = vrot.lane.b32.xlu1 %v1583_v51, %s2849_s24  ;;  %v2280_v61 = vmul.f32 -1.442695, %v1576_v59 }
0x1996   :  { %2660 = vpow2.f32 %v2280_v61 }
0x19a0   :  { %v2661_v63 = vpop.eup %2660 }
0x19a1   :  { %v1580_v2 = vadd.f32 1.0, %v2661_v63 }
0x19a3   :  { %2662 = vrcp.f32 %v1580_v2 }
0x19ad   :  { %v2663_v4 = vpop.eup %2662 }
0x19ae   :  { %v1595_v13 = vsub.f32 1.0, %v2663_v4  ;;  %v1601_v9 = vmul.f32 %v2663_v4, %v1499_v54 }
0x1a06   :  { %v1586_v6 = vpop.permute.xlu1 %1585 }
0x1a07   :  { %v1588_v7 = vmul.f32 %v2663_v4, %v1586_v6 }
0x1a09   :  { %1590 = vrot.lane.b32.xlu0 %v1588_v7, %s2849_s24 }
0x1a7b   :  { %v1591_v8 = vpop.permute.xlu0 %1590 }
0x1a7c   :  { %v1593_v11 = vadd.f32 %v1591_v8, %v1500_v58 }
0x1a7e   :  { %2664 = vtanh.f32 %v1593_v11  ;;  %v1029_v11 = vadd.f32 %v3134_v50, %v3150_v10 }
0x1a88   :  { %v2665_v12 = vpop.eup %2664 }
0x1a89   :  { %1597 = vrot.lane.b32.xlu1 %v2665_v12, %s2850_s3 }
0x1a8d   :  { %801 = vrot.lane.b32.xlu1 %v797_v43, %s2840_s2 }
0x1afb   :  { %v1598_v60 = vpop.permute.xlu1 %1597 }
0x1afc   :  { %v1600_v15 = vmul.f32 %v1598_v60, %v1595_v13 }
0x1afe   :  { %v1602_v18 = vadd.f32 %v1601_v9, %v1600_v15  ;;  %v1030_v15 = vadd.f32 %v3138_v53, %v3150_v10 }
0x1aff   :  { %v802_v3 = vpop.permute.xlu1 %801 }
0x1b00   :  { %1605 = vrot.lane.b32.xlu0 %v1602_v18, %s2850_s3 }
0x1b04   :  { %803 = vrot.lane.b32.xlu0 %v798_v20, %s2840_s2 }
0x1b72   :  { %v1606_v62 = vpop.permute.xlu0 %1605 }
0x1b73   :  { %2404 = vmatmul.mubr.msk.f32.vlgmr.msra.gmra.mrb[12].mxu1 %vm3429_vm3, %v1606_v62 }
0x1b74   :  { %2563 = vmatpush3.bf16.msra.mxu1 %v3170_v14  ;;  %2425 = vmatprep.mubr.msk.f32.mxu1 %vm3422_vm9, %v2848_v1 }
0x1b75   :  { %2564 = vmatprep.subr.bf16.mxu1 %v2846_v0 }
0x1b76   :  { %v804_v16 = vpop.permute.xlu0 %803 }
0x1b77   :  { %v805_v23 = vsel %vm3430_vm4, %v802_v3, %v804_v16 }
0x1b78   :  { %808 = vst.msk [vmem:[#allocation2 + $0x16] sm:$0x3] %vm192_vm1, %v805_v23  ;;  %2566 = vmatpush3.bf16.msra.mxu1 %v3180_v17 }
0x1b79   :  { %2573 = vmatprep.subr.bf16.mxu1 %v2846_v0 }
0x1b7f   :  { %v1603_v31 = vld [vmem:[#allocation2 + $0x16] sm:$0x3] }
0x1c46   :  { %v1675_v5 = vpop.f32.mrb[12].mxu1 }
0x1c47   :  { %v1686_v25 = vadd.f32 %v1675_v5, %v3185_v19  ;;  %v2405_v29 = vpop.f32.mrb[13].mxu1  ;;  %v1679_v32 = vadd.f32 %v1675_v5, %v1603_v31 }
0x1c49   :  { %1688 = vrot.lane.b32.xlu1 %v1686_v25, %s2849_s24  ;;  %v2282_v33 = vmul.f32 -1.442695, %v1679_v32 }
0x1c4b   :  { %2666 = vpow2.f32 %v2282_v33 }
0x1c55   :  { %v2667_v34 = vpop.eup %2666 }
0x1c56   :  { %v1683_v35 = vadd.f32 1.0, %v2667_v34 }
0x1c58   :  { %2668 = vrcp.f32 %v1683_v35 }
0x1c62   :  { %v2669_v36 = vpop.eup %2668 }
0x1c63   :  { %v1698_v45 = vsub.f32 1.0, %v2669_v36  ;;  %v1704_v49 = vmul.f32 %v2669_v36, %v1602_v18 }
0x1cbb   :  { %v1689_v37 = vpop.permute.xlu1 %1688 }
0x1cbc   :  { %v1691_v38 = vmul.f32 %v2669_v36, %v1689_v37  ;;  %v1145_v36 = vadd.f32 %v3198_v28, %v3150_v10 }
0x1cbe   :  { %1693 = vrot.lane.b32.xlu0 %v1691_v38, %s2849_s24 }
0x1d30   :  { %v1694_v40 = vpop.permute.xlu0 %1693 }
0x1d31   :  { %v1696_v26 = vadd.f32 %v1694_v40, %v1603_v31 }
0x1d33   :  { %2670 = vtanh.f32 %v1696_v26 }
0x1d3d   :  { %v2671_v42 = vpop.eup %2670 }
0x1d3e   :  { %1700 = vrot.lane.b32.xlu1 %v2671_v42, %s2850_s3 }
0x1d42   :  { %917 = vrot.lane.b32.xlu1 %v913_v44, %s2840_s2  ;;  %v1146_v44 = vadd.f32 %v3202_v30, %v3150_v10 }
0x1db0   :  { %v1701_v46 = vpop.permute.xlu1 %1700 }
0x1db1   :  { %v1703_v52 = vmul.f32 %v1701_v46, %v1698_v45 }
0x1db3   :  { %v1705_v54 = vadd.f32 %v1704_v49, %v1703_v52 }
0x1db4   :  { %v918_v24 = vpop.permute.xlu1 %917 }
0x1db5   :  { %1708 = vrot.lane.b32.xlu0 %v1705_v54, %s2850_s3 }
0x1db9   :  { %919 = vrot.lane.b32.xlu0 %v914_v47, %s2840_s2 }
0x1e27   :  { %v1709_v55 = vpop.permute.xlu0 %1708 }
0x1e28   :  { %2415 = vmatmul.mubr.msk.f32.vlgmr.msra.gmra.mrb[14].mxu0 %vm3431_vm5, %v1709_v55 }
0x1e29   :  { %2569 = vmatpush3.bf16.msra.mxu0 %v3170_v14  ;;  %2436 = vmatprep.mubr.msk.f32.mxu0 %vm3422_vm9, %v2848_v1 }
0x1e2a   :  { %2570 = vmatprep.subr.bf16.mxu0 %v2846_v0 }
0x1e2b   :  { %v920_v39 = vpop.permute.xlu0 %919 }
0x1e2c   :  { %v921_v56 = vsel %vm3432_vm6, %v918_v24, %v920_v39 }
0x1e2d   :  { %924 = vst.msk [vmem:[#allocation2 + $0x18] sm:$0x3] %vm192_vm1, %v921_v56  ;;  %2572 = vmatpush3.bf16.msra.mxu0 %v3180_v17 }
0x1e2e   :  { %2579 = vmatprep.subr.bf16.mxu0 %v2846_v0 }
0x1e34   :  { %v1706_v51 = vld [vmem:[#allocation2 + $0x18] sm:$0x3] }
0x1efb   :  { %v1778_v27 = vpop.f32.mrb[14].mxu0 }
0x1efc   :  { %v1789_v48 = vadd.f32 %v1778_v27, %v3185_v19  ;;  %v2416_v41 = vpop.f32.mrb[15].mxu0  ;;  %v1782_v57 = vadd.f32 %v1778_v27, %v1706_v51 }
0x1efe   :  { %1791 = vrot.lane.b32.xlu1 %v1789_v48, %s2849_s24  ;;  %v2284_v58 = vmul.f32 -1.442695, %v1782_v57 }
0x1f00   :  { %2672 = vpow2.f32 %v2284_v58  ;;  %v1261_v58 = vadd.f32 %v3239_v21, %v3150_v10 }
0x1f0a   :  { %v2673_v59 = vpop.eup %2672 }
0x1f0b   :  { %v1786_v61 = vadd.f32 1.0, %v2673_v59 }
0x1f0d   :  { %2674 = vrcp.f32 %v1786_v61 }
0x1f17   :  { %v2675_v63 = vpop.eup %2674 }
0x1f18   :  { %v1801_v12 = vsub.f32 1.0, %v2675_v63  ;;  %v1807_v13 = vmul.f32 %v2675_v63, %v1705_v54 }
0x1f70   :  { %v1792_v2 = vpop.permute.xlu1 %1791 }
0x1f71   :  { %v1794_v4 = vmul.f32 %v2675_v63, %v1792_v2 }
0x1f73   :  { %1796 = vrot.lane.b32.xlu0 %v1794_v4, %s2849_s24 }
0x1fe5   :  { %v1797_v6 = vpop.permute.xlu0 %1796 }
0x1fe6   :  { %v1799_v7 = vadd.f32 %v1797_v6, %v1706_v51  ;;  %v1262_v6 = vadd.f32 %v3241_v22, %v3150_v10 }
0x1fe8   :  { %2676 = vtanh.f32 %v1799_v7 }
0x1ff2   :  { %v2677_v8 = vpop.eup %2676 }
0x1ff3   :  { %1803 = vrot.lane.b32.xlu1 %v2677_v8, %s2850_s3 }
0x1ff7   :  { %1033 = vrot.lane.b32.xlu1 %v1029_v11, %s2840_s2 }
0x2065   :  { %v1804_v43 = vpop.permute.xlu1 %1803 }
0x2066   :  { %v1806_v60 = vmul.f32 %v1804_v43, %v1801_v12 }
0x2068   :  { %v1808_v9 = vadd.f32 %v1807_v13, %v1806_v60 }
0x2069   :  { %v1034_v50 = vpop.permute.xlu1 %1033 }
0x206a   :  { %1811 = vrot.lane.b32.xlu0 %v1808_v9, %s2850_s3 }
0x206e   :  { %1035 = vrot.lane.b32.xlu0 %v1030_v15, %s2840_s2 }
0x20dc   :  { %v1812_v18 = vpop.permute.xlu0 %1811 }
0x20dd   :  { %2426 = vmatmul.mubr.msk.f32.vlgmr.msra.gmra.mrb[14].mxu1 %vm3433_vm7, %v1812_v18 }
0x20de   :  { %2575 = vmatpush3.bf16.msra.mxu1 %v3170_v14  ;;  %2447 = vmatprep.mubr.msk.f32.mxu1 %vm3422_vm9, %v2848_v1 }
0x20df   :  { %2576 = vmatprep.subr.bf16.mxu1 %v2846_v0 }
0x20e0   :  { %v1036_v20 = vpop.permute.xlu0 %1035 }
0x20e1   :  { %v1037_v62 = vsel %vm3434_vm8, %v1034_v50, %v1036_v20 }
0x20e2   :  { %1040 = vst.msk [vmem:[#allocation2 + $0x1a] sm:$0x3] %vm192_vm1, %v1037_v62  ;;  %2578 = vmatpush3.bf16.msra.mxu1 %v3180_v17 }
0x20e9   :  { %v1809_v14 = vld [vmem:[#allocation2 + $0x1a] sm:$0x3] }
0x21b0   :  { %v1881_v53 = vpop.f32.mrb[14].mxu1 }
0x21b1   :  { %v1892_v3 = vadd.f32 %v1881_v53, %v3185_v19  ;;  %v2427_v16 = vpop.f32.mrb[15].mxu1  ;;  %v1885_v23 = vadd.f32 %v1881_v53, %v1809_v14 }
0x21b2   :  { %v2127_v16 = vld [vmem:[%s3408_s8 + $0x10] sm:$0xff] }
0x21b3   :  { %1894 = vrot.lane.b32.xlu1 %v1892_v3, %s2849_s24  ;;  %v2286_v5 = vmul.f32 -1.442695, %v1885_v23  ;;  %v2126_v3 = vld [vmem:[%s3408_s8 + $0x8] sm:$0xff]  ;;  %v2128_v23 = vld [vmem:[%s3408_s8 + $0x18] sm:$0xff] }
0x21b5   :  { %2678 = vpow2.f32 %v2286_v5  ;;  %v2583_v5 = vpack.c.bf16 %v2128_v23, %v2127_v16 }
0x21bf   :  { %v2679_v25 = vpop.eup %2678 }
0x21c0   :  { %v1889_v29 = vadd.f32 1.0, %v2679_v25 }
0x21c2   :  { %2680 = vrcp.f32 %v1889_v29 }
0x21cc   :  { %v2681_v31 = vpop.eup %2680 }
0x21cd   :  { %v1904_v37 = vsub.f32 1.0, %v2681_v31  ;;  %v1910_v40 = vmul.f32 %v2681_v31, %v1808_v9 }
0x2225   :  { %v1895_v32 = vpop.permute.xlu1 %1894 }
0x2226   :  { %v1897_v33 = vmul.f32 %v2681_v31, %v1895_v32 }
0x2228   :  { %1899 = vrot.lane.b32.xlu0 %v1897_v33, %s2849_s24 }
0x229a   :  { %v1900_v34 = vpop.permute.xlu0 %1899 }
0x229b   :  { %v1902_v17 = vadd.f32 %v1900_v34, %v1809_v14 }
0x229d   :  { %2682 = vtanh.f32 %v1902_v17 }
0x22a7   :  { %v2683_v35 = vpop.eup %2682 }
0x22a8   :  { %1906 = vrot.lane.b32.xlu1 %v2683_v35, %s2850_s3 }
0x22ac   :  { %1149 = vrot.lane.b32.xlu1 %v1145_v36, %s2840_s2 }
0x231a   :  { %v1907_v38 = vpop.permute.xlu1 %1906 }
0x231b   :  { %v1909_v26 = vmul.f32 %v1907_v38, %v1904_v37 }
0x231d   :  { %v1911_v42 = vadd.f32 %v1910_v40, %v1909_v26 }
0x231e   :  { %v1150_v28 = vpop.permute.xlu1 %1149 }
0x231f   :  { %1914 = vrot.lane.b32.xlu0 %v1911_v42, %s2850_s3 }
0x2323   :  { %1151 = vrot.lane.b32.xlu0 %v1146_v44, %s2840_s2 }
0x2391   :  { %v1915_v45 = vpop.permute.xlu0 %1914 }
0x2392   :  { %2437 = vmatmul.mubr.msk.f32.vlgmr.msra.gmra.mrb[16].mxu0 %vm3435_vm10, %v1915_v45 }
0x2393   :  { %2458 = vmatprep.mubr.msk.f32.mxu0 %vm3422_vm9, %v2848_v1  ;;  %vm3437_vm9 = vmmov %vm3415_vm0 }
0x2395   :  { %v1152_v46 = vpop.permute.xlu0 %1151 }
0x2396   :  { %v1153_v49 = vsel %vm3436_vm11, %v1150_v28, %v1152_v46 }
0x2397   :  { %1156 = vst.msk [vmem:[#allocation2 + $0x1c] sm:$0x3] %vm192_vm1, %v1153_v49 }
0x239e   :  { %v1912_v30 = vld [vmem:[#allocation2 + $0x1c] sm:$0x3] }
0x2465   :  { %v1984_v52 = vpop.f32.mrb[16].mxu0 }
0x2466   :  { %v1995_v54 = vadd.f32 %v1984_v52, %v3185_v19  ;;  %v2438_v47 = vpop.f32.mrb[17].mxu0  ;;  %v1988_v55 = vadd.f32 %v1984_v52, %v1912_v30 }
0x2468   :  { %1997 = vrot.lane.b32.xlu1 %v1995_v54, %s2849_s24  ;;  %v2288_v24 = vmul.f32 -1.442695, %v1988_v55 }
0x246a   :  { %2684 = vpow2.f32 %v2288_v24 }
0x2474   :  { %v2685_v39 = vpop.eup %2684 }
0x2475   :  { %v1992_v56 = vadd.f32 1.0, %v2685_v39 }
0x2477   :  { %2686 = vrcp.f32 %v1992_v56 }
0x2481   :  { %v2687_v1 = vpop.eup %2686 }
0x2482   :  { %v2007_v59 = vsub.f32 1.0, %v2687_v1  ;;  %v2013_v63 = vmul.f32 %v2687_v1, %v1911_v42 }
0x24da   :  { %v1998_v27 = vpop.permute.xlu1 %1997 }
0x24db   :  { %v2000_v48 = vmul.f32 %v2687_v1, %v1998_v27 }
0x24dd   :  { %2002 = vrot.lane.b32.xlu0 %v2000_v48, %s2849_s24 }
0x254f   :  { %v2003_v41 = vpop.permute.xlu0 %2002 }
0x2550   :  { %v2005_v51 = vadd.f32 %v2003_v41, %v1912_v30 }
0x2552   :  { %2688 = vtanh.f32 %v2005_v51 }
0x255c   :  { %v2689_v57 = vpop.eup %2688 }
0x255d   :  { %2009 = vrot.lane.b32.xlu1 %v2689_v57, %s2850_s3 }
0x2561   :  { %1265 = vrot.lane.b32.xlu1 %v1261_v58, %s2840_s2 }
0x25cf   :  { %v2010_v61 = vpop.permute.xlu1 %2009 }
0x25d0   :  { %v2012_v2 = vmul.f32 %v2010_v61, %v2007_v59 }
0x25d2   :  { %v2014_v4 = vadd.f32 %v2013_v63, %v2012_v2 }
0x25d3   :  { %v1266_v8 = vpop.permute.xlu1 %1265 }
0x25d4   :  { %2017 = vrot.lane.b32.xlu0 %v2014_v4, %s2850_s3 }
0x25d8   :  { %1267 = vrot.lane.b32.xlu0 %v1262_v6, %s2840_s2 }
0x2646   :  { %v2018_v7 = vpop.permute.xlu0 %2017 }
0x2647   :  { %2448 = vmatmul.mubr.msk.f32.vlgmr.msra.gmra.mrb[16].mxu1 %vm3437_vm9, %v2018_v7 }
0x264a   :  { %v1268_v11 = vpop.permute.xlu0 %1267 }
0x264b   :  { %v1269_v21 = vsel %vm3438_vm13, %v1266_v8, %v1268_v11 }
0x264c   :  { %1272 = vst.msk [vmem:[#allocation2 + $0x1e] sm:$0x3] %vm192_vm1, %v1269_v21  ;;  %vm3439_vm1 = vmmov %vm3415_vm0 }
0x2653   :  { %v2015_v60 = vld [vmem:[#allocation2 + $0x1e] sm:$0x3] }
0x271a   :  { %v2087_v12 = vpop.f32.mrb[16].mxu1 }
0x271b   :  { %v2098_v43 = vadd.f32 %v2087_v12, %v3185_v19  ;;  %v2449_v13 = vpop.f32.mrb[17].mxu1  ;;  %v2091_v9 = vadd.f32 %v2087_v12, %v2015_v60  ;;  %v2125_v19 = vld [vmem:[%s3408_s8] sm:$0xff]  ;;  %s2851_s8 = smov [#allocation12]  }
0x271c   :  { %v2580_v14 = vpack.c.bf16 %v2126_v3, %v2125_v19  ;;  %s2228_s0 = sshll.u32 %s2851_s8, 4  ;;  %s2229_s0 = int_to_ptr.vmem [resolvable:$true] %s2228_s0 }
0x271d   :  { %2100 = vrot.lane.b32.xlu1 %v2098_v43, %s2849_s24  ;;  %v2290_v10 = vmul.f32 -1.442695, %v2091_v9  ;;  %s2784_s23 = scalar_lea.vmem %s2229_s0, 64  ;;  %p2789_p5 = scmp.lt.s32.totalorder %s2229_s0, %s2229_s0 }
0x271e   :  { %2581 = vmatpush3.bf16.msra.mxu0 %v2580_v14  ;;  %p2785_p4 = scmp.ne.s32.totalorder %s2229_s0, %s2784_s23  ;;  %p2790_p6 = scmp.lt.s32.totalorder %s2784_s23, %s2784_s23 }
0x271f   :  { %2690 = vpow2.f32 %v2290_v10  ;;  %2582 = vmatprep.subr.bf16.mxu0 %v2846_v0 }
0x2720   :  { %p2791_p7 = por %p2790_p6, %p2789_p5 }
0x2722   :  { %2584 = vmatpush3.bf16.msra.mxu0 %v2583_v5  ;;  %p2792_p8 = pnand %p2791_p7, %p2785_p4 }
0x2729   :  { %v2691_v22 = vpop.eup %2690 }
0x272a   :  { %v2095_v15 = vadd.f32 1.0, %v2691_v22 }
0x272c   :  { %2692 = vrcp.f32 %v2095_v15 }
0x2736   :  { %v2693_v18 = vpop.eup %2692 }
0x2737   :  { %v2110_v29 = vsub.f32 1.0, %v2693_v18  ;;  %v2116_v32 = vmul.f32 %v2693_v18, %v2014_v4 }
0x278f   :  { %v2101_v50 = vpop.permute.xlu1 %2100 }
0x2790   :  { %v2103_v20 = vmul.f32 %v2693_v18, %v2101_v50 }
0x2792   :  { %2105 = vrot.lane.b32.xlu0 %v2103_v20, %s2849_s24 }
0x2804   :  { %v2106_v62 = vpop.permute.xlu0 %2105 }
0x2805   :  { %v2108_v53 = vadd.f32 %v2106_v62, %v2015_v60 }
0x2807   :  { %2694 = vtanh.f32 %v2108_v53 }
0x2811   :  { %v2695_v25 = vpop.eup %2694 }
0x2812   :  { %2112 = vrot.lane.b32.xlu1 %v2695_v25, %s2850_s3 }
0x2884   :  { %v2113_v31 = vpop.permute.xlu1 %2112 }
0x2885   :  { %v2115_v33 = vmul.f32 %v2113_v31, %v2110_v29 }
0x2887   :  { %v2117_v34 = vadd.f32 %v2116_v32, %v2115_v33 }
0x2889   :  { %2119 = vrot.lane.b32.xlu1 %v2117_v34, %s2850_s3  ;;  %v2124_v17 = vmax.f32 %v2117_v34, 0.0 }
0x288b   :  { %2137 = vrot.lane.b32.xlu0 %v2124_v17, %s2850_s3 }
0x28fb   :  { %v2120_v35 = vpop.permute.xlu1 %2119 }
0x28fc   :  { %2123 = vst.msk [vmem:[#allocation12 + $0x2] sm:$0x3] %vm1274_vm12, %v2120_v35 }
0x28fd   :  { %v2138_v36 = vpop.permute.xlu0 %2137 }
0x28fe   :  { %2459 = vmatmul.mubr.msk.f32.vlgmr.msra.gmra.mrb[18].mxu0 %vm3439_vm1, %v2138_v36 }
0x28ff   :  { %2795 = shalt.err (!%p2792_p8)
}
0x2900   :  { %s2796_s27 = scalar_lea.hbm %s3411_s11, 64 }
0x2901   :  { %p2797_p9 = scmp.ne.s32.totalorder %s3411_s11, %s2796_s27  ;;  %p2800_p10 = scmp.lt.u32.totalorder %s2796_s27, %s3411_s11 }
0x2903   :  { %p2802_p11 = pnand %p2800_p10, %p2797_p9 }
0x2905   :  { %2805 = shalt.err (!%p2802_p11)
}
0x2906   :  { %2234 = dma.vmem_to_hbm [thread:$0]  %s2229_s0, 64, %s3411_s11, [#allocation13], %s2840_s2, %s2840_s2, %s2841_s18   ;;  %v2291_v0 = vld [vmem:[#allocation9] ss:$0 sm:$0xff]  ;;  %vm2211_vm12 = vcmask 25600  }
0x2907   :  { %s2852_s30 = smov [#allocation11]  }
0x2908   :  { %s2219_s12 = sshll.u32 %s2852_s30, 4  ;;  %s2220_s12 = int_to_ptr.vmem [resolvable:$true] %s2219_s12 }
0x2909   :  { %s2806_s13 = scalar_lea.vmem %s2220_s12, 32  ;;  %p2811_p13 = scmp.lt.s32.totalorder %s2220_s12, %s2220_s12 }
0x290a   :  { %p2807_p12 = scmp.ne.s32.totalorder %s2220_s12, %s2806_s13  ;;  %p2812_p0 = scmp.lt.s32.totalorder %s2806_s13, %s2806_s13 }
0x290c   :  { %p2813_p1 = por %p2812_p0, %p2811_p13 }
0x290e   :  { %p2814_p2 = pnand %p2813_p1, %p2807_p12 }
0x29d1   :  { %v2207_v37 = vpop.f32.mrb[18].mxu0 }
0x29d2   :  { %v2208_v38 = vadd.f32 %v2291_v0, %v2207_v37  ;;  %v2460_v40 = vpop.f32.mrb[19].mxu0 }
0x29d4   :  { %2212 = vst.msk [vmem:[#allocation11] sm:$0x3] %vm2211_vm12, %v2208_v38 }
0x29d5   :  { %2817 = shalt.err (!%p2814_p2)
}
0x29d6   :  { %s2818_s11 = scalar_lea.hbm %s3410_s10, 32 }
0x29d7   :  { %p2819_p3 = scmp.ne.s32.totalorder %s3410_s10, %s2818_s11  ;;  %p2822_p4 = scmp.lt.u32.totalorder %s2818_s11, %s3410_s10 }
0x29d9   :  { %p2824_p5 = pnand %p2822_p4, %p2819_p3 }
0x29db   :  { %2827 = shalt.err (!%p2824_p5)
}
0x29dc   :  { %2222 = dma.vmem_to_hbm [thread:$0]  %s2220_s12, 32, %s3410_s10, [#allocation5]  }
0x29dd   :  { %2834 = dma.done.wait [#allocation5], 32  }
0x29de   :  { %2835 = vsyncadd [#allocation5], 4294967264 }
0x29df   :  { %2836 = dma.done.wait [#allocation13], 64  }
0x29e0   :  { %2837 = vsyncadd [#allocation13], 4294967232 }
0x29e1   :  { %2241 = vsyncpa [#allocation4], 1 }
0x29e2   :  { %2242 = vsyncpa [#allocation7], 1 }
0x29e3   :  { %2243 = vsyncpa [#allocation10], 1 }
0x29e4   :  { %2244 = vsyncpa [#allocation5], 1 }
0x29e5   :  { %2245 = vsyncpa [#allocation13], 1 }

</bundles_post_ra>
